<compile_context>
chip_gen: v7x
topology: tpu7x:2x2x1
jax: 0.10.0
libtpu: 0.0.40
codegen_flags: <defaults>
</compile_context>

<pallas_src>
import functools

import jax
import jax.numpy as jnp
from jax.experimental import pallas as pl
from jax.experimental.pallas import tpu as pltpu

EPS = 1e-5


def _round_up(x, m):
    return ((x + m - 1) // m) * m


# ----------------------------------------------------------------------------
# In-kernel helpers
# ----------------------------------------------------------------------------
def _bn_relu(x, sum_sh, sq_sh, gamma, beta, inv_count):
    """Training-mode BatchNorm1d (full-M stats, biased var) + ReLU, f32 math.

    sum_sh / sq_sh are (num_shards, 1, H) per-core partials; the tiny shard
    axis is reduced in-kernel.
    """
    s = jnp.sum(sum_sh, axis=0)
    q = jnp.sum(sq_sh, axis=0)
    mean = s * inv_count
    var = jnp.maximum(q * inv_count - mean * mean, 0.0)
    xn = (x - mean) * jax.lax.rsqrt(var + EPS)
    return jnp.maximum(gamma * xn + beta, 0.0)


def _accum_stats(sum_ref, sq_ref, y, mask_info):
    """Accumulate per-channel sum / sumsq across the inner (M) grid axis.

    Each shard (outer, "parallel" grid axis) owns its own (1, H) block.
    mask_info = (tm, tiles_per_shard, valid_rows) when M was padded.
    """
    if mask_info is not None:
        tm, tps, valid = mask_info
        tile = pl.program_id(0) * tps + pl.program_id(1)
        rows = jax.lax.broadcasted_iota(jnp.int32, y.shape, 0) + tile * tm
        y = jnp.where(rows < valid, y, 0.0)

    @pl.when(pl.program_id(1) == 0)
    def _():
        sum_ref[...] = jnp.zeros_like(sum_ref)
        sq_ref[...] = jnp.zeros_like(sq_ref)

    sum_ref[...] += jnp.sum(y, axis=0, keepdims=True)
    sq_ref[...] += jnp.sum(y * y, axis=0, keepdims=True)


# ----------------------------------------------------------------------------
# Stage kernels (tiled over M; per-channel stats outputs are shard-resident)
# ----------------------------------------------------------------------------
def head_kernel(mask_info, cxyz_ref, w_ref, b_ref, net_ref, sum_ref, sq_ref):
    # net = conv_p(c_xyz); also accumulate stats(net) for block 0's bn_0.
    net = jnp.dot(cxyz_ref[...], w_ref[...],
                  preferred_element_type=jnp.float32) + b_ref[...]
    net_bf = net.astype(jnp.bfloat16)
    net_ref[...] = net_bf
    # Stats on bf16-rounded values = exactly what the next stage reads.
    _accum_stats(sum_ref, sq_ref, net_bf.astype(jnp.float32), mask_info)


def block_stats_kernel(inv_count, mask_info, net_ref, nsum_ref, nsq_ref,
                       g0_ref, b0_ref, w0_ref, fb0_ref, hsum_ref, hsq_ref):
    # Stats-only pass: h = fc_0(relu(bn_0(net))) is computed but NOT stored;
    # only sum/sumsq(h) are emitted (bn_1 statistics).
    a = _bn_relu(net_ref[...].astype(jnp.float32), nsum_ref[...], nsq_ref[...],
                 g0_ref[...], b0_ref[...], inv_count)
    h = jnp.dot(a.astype(jnp.bfloat16), w0_ref[...],
                preferred_element_type=jnp.float32) + fb0_ref[...]
    _accum_stats(hsum_ref, hsq_ref, h, mask_info)


def block_main_kernel(inv_count, mask_info, net_ref, nsum_ref, nsq_ref,
                      g0_ref, b0_ref, w0_ref, fb0_ref,
                      hsum_ref, hsq_ref, g1_ref, b1_ref,
                      w1_ref, wc_ref, bcat_ref, cxyz_ref,
                      out_ref, osum_ref, osq_ref):
    # Recompute h (bit-identical to the stats pass), then
    # net_new = net + fc_1(relu(bn_1(h))) + fc_c(c_xyz); emit stats(net_new).
    # bcat_ref = fc1_b + fcc_b (combined in the wrapper).
    net = net_ref[...].astype(jnp.float32)
    a = _bn_relu(net, nsum_ref[...], nsq_ref[...], g0_ref[...], b0_ref[...],
                 inv_count)
    h = jnp.dot(a.astype(jnp.bfloat16), w0_ref[...],
                preferred_element_type=jnp.float32) + fb0_ref[...]
    a1 = _bn_relu(h, hsum_ref[...], hsq_ref[...], g1_ref[...], b1_ref[...],
                  inv_count)
    y = jnp.dot(a1.astype(jnp.bfloat16), w1_ref[...],
                preferred_element_type=jnp.float32)
    y = y + jnp.dot(cxyz_ref[...], wc_ref[...],
                    preferred_element_type=jnp.float32)
    y = y + bcat_ref[...] + net          # identity shortcut (size_in == size_out)
    y_bf = y.astype(jnp.bfloat16)
    out_ref[...] = y_bf
    _accum_stats(osum_ref, osq_ref, y_bf.astype(jnp.float32), mask_info)


def tail_kernel(inv_count, net_ref, nsum_ref, nsq_ref, g_ref, b_ref,
                w_ref, bias_ref, out_ref):
    # out = conv_out(relu(bn_out(net))) -- written directly at out_dim lanes.
    a = _bn_relu(net_ref[...].astype(jnp.float32), nsum_ref[...], nsq_ref[...],
                 g_ref[...], b_ref[...], inv_count)
    out = jnp.dot(a.astype(jnp.bfloat16), w_ref[...],
                  preferred_element_type=jnp.float32) + bias_ref[...]
    out_ref[...] = out[:, :out_ref.shape[1]].astype(out_ref.dtype)


# ----------------------------------------------------------------------------
# BlockSpec / compiler-param / tiling helpers
# ----------------------------------------------------------------------------
def _tiled(tm, cols, tps=None):
    if tps is None:
        return pl.BlockSpec((tm, cols), lambda m: (m, 0))
    return pl.BlockSpec((tm, cols), lambda s, m: (s * tps + m, 0))


def _resident(shape, grid_rank):
    zero = tuple(0 for _ in shape)
    if grid_rank == 1:
        return pl.BlockSpec(shape, lambda m: zero)
    return pl.BlockSpec(shape, lambda s, m: zero)


def _stats_out_spec(H):
    # One (1, H) accumulator block per shard (outer grid axis).
    return pl.BlockSpec((None, 1, H), lambda s, m: (s, 0, 0))


def _cparams(tile_bytes, semantics):
    # Generation-aware VMEM cap: ~48 MiB on v7x (64 MiB physical per core),
    # ~96 MiB on v5e/v6e (128 MiB physical).
    try:
        cap = int(pltpu.get_tpu_info().vmem_capacity_bytes)
    except Exception:
        cap = 64 << 20
    headroom = (cap * 3) // 4
    limit = int(min(max(2 * tile_bytes + (8 << 20), 32 << 20), headroom))
    return pltpu.CompilerParams(dimension_semantics=semantics,
                                vmem_limit_bytes=limit)


def _choose_tiling(M, max_tile):
    """Return (tm, M_pad): tm is a multiple of 8; M_pad a multiple of tm."""
    max_tile = max(8, (max_tile // 8) * 8)
    for t in (4096, 2048, 1024, 512, 256, 128, 64, 32, 16, 8):
        if t <= max_tile and M % t == 0:
            return t, M
    if M <= max_tile:
        t = _round_up(M, 8)
        return t, t
    return max_tile, _round_up(M, max_tile)


# ----------------------------------------------------------------------------
# Parameters (synthetic, weights stored (in, out) for x @ W)
# ----------------------------------------------------------------------------
def init_params(key, z_dim, dim, out_dim, hidden_size, num_blocks):
    c_dim = z_dim + dim
    H = hidden_size
    keys = jax.random.split(key, 16)
    normal = lambda k, shape, s=0.1: (s * jax.random.normal(k, shape)).astype(jnp.float32)
    return {
        "conv_p_w": normal(keys[0], (c_dim, H)),
        "conv_p_b": normal(keys[1], (1, H)),
        "bn0_g": 1.0 + normal(keys[2], (num_blocks, 1, H)),
        "bn0_b": normal(keys[3], (num_blocks, 1, H)),
        "bn1_g": 1.0 + normal(keys[4], (num_blocks, 1, H)),
        "bn1_b": normal(keys[5], (num_blocks, 1, H)),
        "fc0_w": normal(keys[6], (num_blocks, H, H)),
        "fc0_b": normal(keys[7], (num_blocks, 1, H)),
        "fc1_w": jnp.zeros((num_blocks, H, H), jnp.float32),   # nn.init.zeros_
        "fc1_b": normal(keys[8], (num_blocks, 1, H)),
        "fcc_w": normal(keys[9], (num_blocks, c_dim, H)),
        "fcc_b": normal(keys[10], (num_blocks, 1, H)),
        "bn_out_g": 1.0 + normal(keys[11], (1, H)),
        "bn_out_b": normal(keys[12], (1, H)),
        "conv_out_w": normal(keys[13], (H, out_dim)),
        "conv_out_b": normal(keys[14], (1, out_dim)),
    }


# ----------------------------------------------------------------------------
# Forward pass
# ----------------------------------------------------------------------------
@functools.partial(jax.jit,
                   static_argnames=("out_dim", "num_blocks", "max_rows_per_tile"))
def scorenet_forward(x, c, params, *, out_dim, num_blocks, max_rows_per_tile=1024):
    """x: (bs, npoints, dim), c: (bs, z_dim) -> (bs, npoints, out_dim)."""
    bs, n_pts, dim = x.shape
    z_dim = c.shape[1]
    c_dim = z_dim + dim
    H = params["conv_p_w"].shape[1]
    M = bs * n_pts

    tm, M_pad = _choose_tiling(M, max_rows_per_tile)
    n_tiles = M_pad // tm
    num_shards = 2 if n_tiles % 2 == 0 else 1      # v7x: one shard per TensorCore
    tps = n_tiles // num_shards
    inv_m = 1.0 / float(M)                          # BN stats use the true M
    mask_info = (tm, tps, M) if M_pad != M else None
    CPAD = _round_up(max(c_dim, 128), 128)
    OUT_PAD = _round_up(max(out_dim, 128), 128)

    # c_xyz built channels-last, zero-padded to 128 lanes, stored bf16.
    cxyz = jnp.concatenate(
        [x, jnp.broadcast_to(c[:, None, :], (bs, n_pts, z_dim))], axis=-1
    ).reshape(M, c_dim).astype(jnp.float32)
    cxyz = jnp.pad(cxyz, ((0, M_pad - M), (0, CPAD - c_dim))).astype(jnp.bfloat16)

    # bf16 weights (MXU-native); zero-padded rows/cols keep numerics exact.
    w_p = jnp.zeros((CPAD, H), jnp.bfloat16).at[:c_dim].set(
        params["conv_p_w"].astype(jnp.bfloat16))
    fc0_w = params["fc0_w"].astype(jnp.bfloat16)
    fc1_w = params["fc1_w"].astype(jnp.bfloat16)
    fcc_w = jnp.zeros((num_blocks, CPAD, H), jnp.bfloat16).at[:, :c_dim].set(
        params["fcc_w"].astype(jnp.bfloat16))
    cow = jnp.zeros((H, OUT_PAD), jnp.bfloat16).at[:, :out_dim].set(
        params["conv_out_w"].astype(jnp.bfloat16))
    cob = jnp.zeros((1, OUT_PAD), jnp.float32).at[:, :out_dim].set(
        params["conv_out_b"])

    grid2 = (num_shards, tps)
    sem2 = ("parallel", "arbitrary")
    stats_shape = (jax.ShapeDtypeStruct((num_shards, 1, H), jnp.float32),) * 2
    stats_out = (_stats_out_spec(H),) * 2
    stats_in = [_resident((num_shards, 1, H), 2)] * 2
    act_shape = jax.ShapeDtypeStruct((M_pad, H), jnp.bfloat16)
    bn_res = _resident((1, H), 2)

    # ---- head: net = conv_p(c_xyz); stats(net) for block 0's bn_0 -----------
    net, n_sum, n_sq = pl.pallas_call(
        functools.partial(head_kernel, mask_info),
        grid=grid2,
        in_specs=[_tiled(tm, CPAD, tps), _resident((CPAD, H), 2), bn_res],
        out_specs=(_tiled(tm, H, tps),) + stats_out,
        out_shape=(act_shape,) + stats_shape,
        compiler_params=_cparams(tm * (CPAD + H) * 2, sem2),
    )(cxyz, w_p, params["conv_p_b"])

    # ---- ResNet blocks: stats pass (no h materialization) + main pass -------
    for i in range(num_blocks):
        h_sum, h_sq = pl.pallas_call(
            functools.partial(block_stats_kernel, inv_m, mask_info),
            grid=grid2,
            in_specs=[_tiled(tm, H, tps)] + stats_in
                     + [bn_res, bn_res, _resident((H, H), 2), bn_res],
            out_specs=stats_out,
            out_shape=stats_shape,
            compiler_params=_cparams(tm * H * 2, sem2),
        )(net, n_sum, n_sq, params["bn0_g"][i], params["bn0_b"][i],
          fc0_w[i], params["fc0_b"][i])

        bcat = params["fc1_b"][i] + params["fcc_b"][i]
        net, n_sum, n_sq = pl.pallas_call(
            functools.partial(block_main_kernel, inv_m, mask_info),
            grid=grid2,
            in_specs=[_tiled(tm, H, tps)] + stats_in
                     + [bn_res, bn_res, _resident((H, H), 2), bn_res]
                     + stats_in
                     + [bn_res, bn_res, _resident((H, H), 2),
                        _resident((CPAD, H), 2), bn_res, _tiled(tm, CPAD, tps)],
            out_specs=(_tiled(tm, H, tps),) + stats_out,
            out_shape=(act_shape,) + stats_shape,
            input_output_aliases={0: 0},      # in-place residual update of net
            compiler_params=_cparams(tm * (2 * H + CPAD) * 2, sem2),
        )(net, n_sum, n_sq, params["bn0_g"][i], params["bn0_b"][i],
          fc0_w[i], params["fc0_b"][i],
          h_sum, h_sq, params["bn1_g"][i], params["bn1_b"][i],
          fc1_w[i], fcc_w[i], bcat, cxyz)

    # ---- tail: conv_out(relu(bn_out(net))), direct (M, out_dim) store -------
    out = pl.pallas_call(
        functools.partial(tail_kernel, inv_m),
        grid=(n_tiles,),
        in_specs=[_tiled(tm, H),
                  _resident((num_shards, 1, H), 1),
                  _resident((num_shards, 1, H), 1),
                  _resident((1, H), 1), _resident((1, H), 1),
                  _resident((H, OUT_PAD), 1), _resident((1, OUT_PAD), 1)],
        out_specs=_tiled(tm, out_dim),
        out_shape=jax.ShapeDtypeStruct((M_pad, out_dim), jnp.float32),
        compiler_params=_cparams(tm * (H * 2 + out_dim * 4), ("parallel",)),
    )(net, n_sum, n_sq, params["bn_out_g"], params["bn_out_b"], cow, cob)

    return out[:M].reshape(bs, n_pts, out_dim)


# ----------------------------------------------------------------------------
# Pure-JAX reference (f32) for correctness checking
# ----------------------------------------------------------------------------
def scorenet_reference(x, c, params, *, out_dim, num_blocks):
    bs, n_pts, _ = x.shape
    z_dim = c.shape[1]
    cxyz = jnp.concatenate(
        [x, jnp.broadcast_to(c[:, None, :], (bs, n_pts, z_dim))], axis=-1
    ).reshape(bs * n_pts, -1).astype(jnp.float32)

    def bn_relu(v, g, b):
        mean = jnp.mean(v, axis=0, keepdims=True)
        var = jnp.maximum(jnp.mean(v * v, axis=0, keepdims=True) - mean * mean, 0.0)
        return jnp.maximum(g * (v - mean) * jax.lax.rsqrt(var + EPS) + b, 0.0)

    net = cxyz @ params["conv_p_w"] + params["conv_p_b"]
    for i in range(num_blocks):
        h = bn_relu(net, params["bn0_g"][i], params["bn0_b"][i]) @ params["fc0_w"][i] \
            + params["fc0_b"][i]
        dx = bn_relu(h, params["bn1_g"][i], params["bn1_b"][i]) @ params["fc1_w"][i] \
            + params["fc1_b"][i]
        fcc = cxyz @ params["fcc_w"][i] + params["fcc_b"][i]
        net = net + dx + fcc
    out = bn_relu(net, params["bn_out_g"], params["bn_out_b"]) @ params["conv_out_w"] \
        + params["conv_out_b"]
    return out.reshape(bs, n_pts, out_dim)


if __name__ == "__main__":
    bs, n_pts, dim = 2, 16, 3
    z_dim, hidden_size, out_dim, num_blocks = 8, 32, 3, 2

    key = jax.random.PRNGKey(0)
    kx, kc, kp = jax.random.split(key, 3)
    x = jax.random.normal(kx, (bs, n_pts, dim), dtype=jnp.float32)
    c = jax.random.normal(kc, (bs, z_dim), dtype=jnp.float32)
    params = init_params(kp, z_dim, dim, out_dim, hidden_size, num_blocks)

    # Small max_rows_per_tile so the multi-tile cross-tile stats accumulation
    # AND the 2-shard (megacore) grid axis are exercised even at this toy size
    # (M = 32 -> 4 row tiles of 8 -> 2 shards x 2 tiles).
    out = scorenet_forward(x, c, params, out_dim=out_dim, num_blocks=num_blocks,
                           max_rows_per_tile=8)
    jax.block_until_ready(out)
    assert out.shape == (bs, n_pts, out_dim)
    ref = scorenet_reference(x, c, params, out_dim=out_dim, num_blocks=num_blocks)
    err = float(jnp.max(jnp.abs(out - ref)))
    assert err < 5e-2, f"mismatch vs reference: max abs err = {err}"

    # Ragged-M path: M = 30 -> padded to 32 rows with masked BN statistics.
    x2 = x[:, :15]
    out2 = scorenet_forward(x2, c, params, out_dim=out_dim, num_blocks=num_blocks,
                            max_rows_per_tile=8)
    jax.block_until_ready(out2)
    ref2 = scorenet_reference(x2, c, params, out_dim=out_dim, num_blocks=num_blocks)
    err2 = float(jnp.max(jnp.abs(out2 - ref2)))
    assert err2 < 5e-2, f"padded-path mismatch vs reference: max abs err = {err2}"

    print("KERNEL_OK")
</pallas_src>

<mosaic_0001>
module attributes {stable_mosaic.version = 11 : i64} {
  func.func @block_stats_kernel(%arg0: i32, %arg1: i32, %arg2: memref<8x32xbf16, #tpu.memory_space<vmem>>, %arg3: memref<2x1x32xf32, #tpu.memory_space<vmem>>, %arg4: memref<2x1x32xf32, #tpu.memory_space<vmem>>, %arg5: memref<1x32xf32, #tpu.memory_space<vmem>>, %arg6: memref<1x32xf32, #tpu.memory_space<vmem>>, %arg7: memref<32x32xbf16, #tpu.memory_space<vmem>>, %arg8: memref<1x32xf32, #tpu.memory_space<vmem>>, %arg9: memref<1x1x32xf32, #tpu.memory_space<vmem>>, %arg10: memref<1x1x32xf32, #tpu.memory_space<vmem>>) attributes {dimension_semantics = [#tpu.dimension_semantics<parallel>, #tpu.dimension_semantics<arbitrary>], iteration_bounds = array<i64: 2, 2>, scalar_prefetch = 0 : i64, scratch_operands = 0 : i64, tpu.core_type = #tpu.core_type<tc>, window_params = [{transform_indices = @transform_0, window_bounds = array<i64: 8, 32>}, {pipeline_mode = #tpu.pipeline_mode<synchronous>, transform_indices = @transform_1, window_bounds = array<i64: 2, 1, 32>}, {pipeline_mode = #tpu.pipeline_mode<synchronous>, transform_indices = @transform_2, window_bounds = array<i64: 2, 1, 32>}, {pipeline_mode = #tpu.pipeline_mode<synchronous>, transform_indices = @transform_3, window_bounds = array<i64: 1, 32>}, {pipeline_mode = #tpu.pipeline_mode<synchronous>, transform_indices = @transform_4, window_bounds = array<i64: 1, 32>}, {pipeline_mode = #tpu.pipeline_mode<synchronous>, transform_indices = @transform_5, window_bounds = array<i64: 32, 32>}, {pipeline_mode = #tpu.pipeline_mode<synchronous>, transform_indices = @transform_6, window_bounds = array<i64: 1, 32>}, {transform_indices = @transform_7, window_bounds = array<i64: 1, 1, 32>}, {transform_indices = @transform_8, window_bounds = array<i64: 1, 1, 32>}]} {
    %c0 = arith.constant 0 : index
    %c0_0 = arith.constant 0 : index
    %0 = vector.load %arg2[%c0, %c0_0] : memref<8x32xbf16, #tpu.memory_space<vmem>>, vector<8x32xbf16>
    %1 = arith.extf %0 : vector<8x32xbf16> to vector<8x32xf32>
    %c0_1 = arith.constant 0 : index
    %c0_2 = arith.constant 0 : index
    %c0_3 = arith.constant 0 : index
    %2 = vector.load %arg3[%c0_1, %c0_2, %c0_3] : memref<2x1x32xf32, #tpu.memory_space<vmem>>, vector<2x1x32xf32>
    %c0_4 = arith.constant 0 : index
    %c0_5 = arith.constant 0 : index
    %c0_6 = arith.constant 0 : index
    %3 = vector.load %arg4[%c0_4, %c0_5, %c0_6] : memref<2x1x32xf32, #tpu.memory_space<vmem>>, vector<2x1x32xf32>
    %c0_7 = arith.constant 0 : index
    %c0_8 = arith.constant 0 : index
    %4 = vector.load %arg5[%c0_7, %c0_8] : memref<1x32xf32, #tpu.memory_space<vmem>>, vector<1x32xf32>
    %c0_9 = arith.constant 0 : index
    %c0_10 = arith.constant 0 : index
    %5 = vector.load %arg6[%c0_9, %c0_10] : memref<1x32xf32, #tpu.memory_space<vmem>>, vector<1x32xf32>
    %cst = arith.constant dense<0.000000e+00> : vector<1x32xf32>
    %6 = vector.multi_reduction <add>, %2, %cst [0] : vector<2x1x32xf32> to vector<1x32xf32>
    %cst_11 = arith.constant dense<0.000000e+00> : vector<1x32xf32>
    %7 = vector.multi_reduction <add>, %3, %cst_11 [0] : vector<2x1x32xf32> to vector<1x32xf32>
    %cst_12 = arith.constant 3.125000e-02 : f32
    %8 = vector.broadcast %cst_12 : f32 to vector<1x32xf32>
    %9 = arith.mulf %6, %8 : vector<1x32xf32>
    %cst_13 = arith.constant 3.125000e-02 : f32
    %10 = vector.broadcast %cst_13 : f32 to vector<1x32xf32>
    %11 = arith.mulf %7, %10 : vector<1x32xf32>
    %12 = arith.mulf %9, %9 : vector<1x32xf32>
    %13 = arith.subf %11, %12 : vector<1x32xf32>
    %cst_14 = arith.constant 0.000000e+00 : f32
    %14 = vector.broadcast %cst_14 : f32 to vector<1x32xf32>
    %15 = arith.maximumf %13, %14 : vector<1x32xf32>
    %16 = vector.broadcast %9 : vector<1x32xf32> to vector<8x32xf32>
    %17 = arith.subf %1, %16 : vector<8x32xf32>
    %cst_15 = arith.constant 9.99999974E-6 : f32
    %18 = vector.broadcast %cst_15 : f32 to vector<1x32xf32>
    %19 = arith.addf %15, %18 : vector<1x32xf32>
    %20 = math.rsqrt %19 : vector<1x32xf32>
    %21 = vector.broadcast %20 : vector<1x32xf32> to vector<8x32xf32>
    %22 = arith.mulf %17, %21 : vector<8x32xf32>
    %23 = vector.broadcast %4 : vector<1x32xf32> to vector<8x32xf32>
    %24 = arith.mulf %23, %22 : vector<8x32xf32>
    %25 = vector.broadcast %5 : vector<1x32xf32> to vector<8x32xf32>
    %26 = arith.addf %24, %25 : vector<8x32xf32>
    %cst_16 = arith.constant 0.000000e+00 : f32
    %27 = vector.broadcast %cst_16 : f32 to vector<8x32xf32>
    %28 = arith.maximumf %26, %27 : vector<8x32xf32>
    %29 = arith.truncf %28 : vector<8x32xf32> to vector<8x32xbf16>
    %c0_17 = arith.constant 0 : index
    %c0_18 = arith.constant 0 : index
    %30 = vector.load %arg7[%c0_17, %c0_18] : memref<32x32xbf16, #tpu.memory_space<vmem>>, vector<32x32xbf16>
    %cst_19 = arith.constant dense<0.000000e+00> : vector<8x32xf32>
    %31 = tpu.matmul %29, %30, %cst_19 {dimension_numbers = #tpu.dot_dimension_numbers<[1], [0], [0], [1], [0, 0, 1, 1], [], []>} : vector<8x32xbf16>, vector<32x32xbf16>, vector<8x32xf32> -> vector<8x32xf32>
    %c0_20 = arith.constant 0 : index
    %c0_21 = arith.constant 0 : index
    %32 = vector.load %arg8[%c0_20, %c0_21] : memref<1x32xf32, #tpu.memory_space<vmem>>, vector<1x32xf32>
    %33 = vector.broadcast %32 : vector<1x32xf32> to vector<8x32xf32>
    %34 = arith.addf %31, %33 : vector<8x32xf32>
    %c0_i32 = arith.constant 0 : i32
    %35 = arith.cmpi eq, %arg1, %c0_i32 : i32
    %36 = arith.extui %35 : i1 to i32
    %c0_i32_22 = arith.constant 0 : i32
    %37 = arith.cmpi ne, %36, %c0_i32_22 : i32
    scf.if %37 {
      %cst_37 = arith.constant 0.000000e+00 : f32
      %55 = vector.broadcast %cst_37 : f32 to vector<1x32xf32>
      %c0_38 = arith.constant 0 : index
      %c0_39 = arith.constant 0 : index
      %c0_40 = arith.constant 0 : index
      %56 = vector.load %arg9[%c0_38, %c0_39, %c0_40] : memref<1x1x32xf32, #tpu.memory_space<vmem>>, vector<1x1x32xf32>
      %57 = vector.shape_cast %56 : vector<1x1x32xf32> to vector<1x32xf32>
      %58 = vector.shape_cast %55 : vector<1x32xf32> to vector<1x1x32xf32>
      tpu.vector_store %arg9[%c0_38, %c0_39, %c0_40], %58 {strides = array<i32>} : memref<1x1x32xf32, #tpu.memory_space<vmem>>, vector<1x1x32xf32>,
      %cst_41 = arith.constant 0.000000e+00 : f32
      %59 = vector.broadcast %cst_41 : f32 to vector<1x32xf32>
      %c0_42 = arith.constant 0 : index
      %c0_43 = arith.constant 0 : index
      %c0_44 = arith.constant 0 : index
      %60 = vector.load %arg10[%c0_42, %c0_43, %c0_44] : memref<1x1x32xf32, #tpu.memory_space<vmem>>, vector<1x1x32xf32>
      %61 = vector.shape_cast %60 : vector<1x1x32xf32> to vector<1x32xf32>
      %62 = vector.shape_cast %59 : vector<1x32xf32> to vector<1x1x32xf32>
      tpu.vector_store %arg10[%c0_42, %c0_43, %c0_44], %62 {strides = array<i32>} : memref<1x1x32xf32, #tpu.memory_space<vmem>>, vector<1x1x32xf32>,
    } else {
    }
    %c0_23 = arith.constant 0 : index
    %c0_24 = arith.constant 0 : index
    %c0_25 = arith.constant 0 : index
    %38 = vector.load %arg9[%c0_23, %c0_24, %c0_25] : memref<1x1x32xf32, #tpu.memory_space<vmem>>, vector<1x1x32xf32>
    %39 = vector.shape_cast %38 : vector<1x1x32xf32> to vector<1x32xf32>
    %cst_26 = arith.constant dense<0.000000e+00> : vector<32xf32>
    %40 = vector.multi_reduction <add>, %34, %cst_26 [0] : vector<8x32xf32> to vector<32xf32>
    %41 = vector.shape_cast %40 : vector<32xf32> to vector<1x32xf32>
    %42 = arith.addf %39, %41 : vector<1x32xf32>
    %c0_27 = arith.constant 0 : index
    %c0_28 = arith.constant 0 : index
    %c0_29 = arith.constant 0 : index
    %43 = vector.load %arg9[%c0_27, %c0_28, %c0_29] : memref<1x1x32xf32, #tpu.memory_space<vmem>>, vector<1x1x32xf32>
    %44 = vector.shape_cast %43 : vector<1x1x32xf32> to vector<1x32xf32>
    %45 = vector.shape_cast %42 : vector<1x32xf32> to vector<1x1x32xf32>
    tpu.vector_store %arg9[%c0_27, %c0_28, %c0_29], %45 {strides = array<i32>} : memref<1x1x32xf32, #tpu.memory_space<vmem>>, vector<1x1x32xf32>,
    %c0_30 = arith.constant 0 : index
    %c0_31 = arith.constant 0 : index
    %c0_32 = arith.constant 0 : index
    %46 = vector.load %arg10[%c0_30, %c0_31, %c0_32] : memref<1x1x32xf32, #tpu.memory_space<vmem>>, vector<1x1x32xf32>
    %47 = vector.shape_cast %46 : vector<1x1x32xf32> to vector<1x32xf32>
    %48 = arith.mulf %34, %34 : vector<8x32xf32>
    %cst_33 = arith.constant dense<0.000000e+00> : vector<32xf32>
    %49 = vector.multi_reduction <add>, %48, %cst_33 [0] : vector<8x32xf32> to vector<32xf32>
    %50 = vector.shape_cast %49 : vector<32xf32> to vector<1x32xf32>
    %51 = arith.addf %47, %50 : vector<1x32xf32>
    %c0_34 = arith.constant 0 : index
    %c0_35 = arith.constant 0 : index
    %c0_36 = arith.constant 0 : index
    %52 = vector.load %arg10[%c0_34, %c0_35, %c0_36] : memref<1x1x32xf32, #tpu.memory_space<vmem>>, vector<1x1x32xf32>
    %53 = vector.shape_cast %52 : vector<1x1x32xf32> to vector<1x32xf32>
    %54 = vector.shape_cast %51 : vector<1x32xf32> to vector<1x1x32xf32>
    tpu.vector_store %arg10[%c0_34, %c0_35, %c0_36], %54 {strides = array<i32>} : memref<1x1x32xf32, #tpu.memory_space<vmem>>, vector<1x1x32xf32>,
    return
  }
  func.func @transform_0(%arg0: i32, %arg1: i32) -> (i32, i32) {
    %c2_i32 = arith.constant 2 : i32
    %0 = arith.muli %arg0, %c2_i32 : i32
    %1 = arith.addi %0, %arg1 : i32
    %c0_i32 = arith.constant 0 : i32
    %c0_i32_0 = arith.constant 0 : i32
    return %1, %c0_i32 : i32, i32
  }
  func.func @transform_1(%arg0: i32, %arg1: i32) -> (i32, i32, i32) {
    %c0_i32 = arith.constant 0 : i32
    %c0_i32_0 = arith.constant 0 : i32
    %c0_i32_1 = arith.constant 0 : i32
    %c0_i32_2 = arith.constant 0 : i32
    return %c0_i32, %c0_i32_0, %c0_i32_1 : i32, i32, i32
  }
  func.func @transform_2(%arg0: i32, %arg1: i32) -> (i32, i32, i32) {
    %c0_i32 = arith.constant 0 : i32
    %c0_i32_0 = arith.constant 0 : i32
    %c0_i32_1 = arith.constant 0 : i32
    %c0_i32_2 = arith.constant 0 : i32
    return %c0_i32, %c0_i32_0, %c0_i32_1 : i32, i32, i32
  }
  func.func @transform_3(%arg0: i32, %arg1: i32) -> (i32, i32) {
    %c0_i32 = arith.constant 0 : i32
    %c0_i32_0 = arith.constant 0 : i32
    %c0_i32_1 = arith.constant 0 : i32
    return %c0_i32, %c0_i32_0 : i32, i32
  }
  func.func @transform_4(%arg0: i32, %arg1: i32) -> (i32, i32) {
    %c0_i32 = arith.constant 0 : i32
    %c0_i32_0 = arith.constant 0 : i32
    %c0_i32_1 = arith.constant 0 : i32
    return %c0_i32, %c0_i32_0 : i32, i32
  }
  func.func @transform_5(%arg0: i32, %arg1: i32) -> (i32, i32) {
    %c0_i32 = arith.constant 0 : i32
    %c0_i32_0 = arith.constant 0 : i32
    %c0_i32_1 = arith.constant 0 : i32
    return %c0_i32, %c0_i32_0 : i32, i32
  }
  func.func @transform_6(%arg0: i32, %arg1: i32) -> (i32, i32) {
    %c0_i32 = arith.constant 0 : i32
    %c0_i32_0 = arith.constant 0 : i32
    %c0_i32_1 = arith.constant 0 : i32
    return %c0_i32, %c0_i32_0 : i32, i32
  }
  func.func @transform_7(%arg0: i32, %arg1: i32) -> (i32, i32, i32) {
    %c0_i32 = arith.constant 0 : i32
    %c0_i32_0 = arith.constant 0 : i32
    %c0_i32_1 = arith.constant 0 : i32
    return %arg0, %c0_i32, %c0_i32_0 : i32, i32, i32
  }
  func.func @transform_8(%arg0: i32, %arg1: i32) -> (i32, i32, i32) {
    %c0_i32 = arith.constant 0 : i32
    %c0_i32_0 = arith.constant 0 : i32
    %c0_i32_1 = arith.constant 0 : i32
    return %arg0, %c0_i32, %c0_i32_0 : i32, i32, i32
  }
}

module attributes {stable_mosaic.version = 11 : i64} {
  func.func @head_kernel(%arg0: i32, %arg1: i32, %arg2: memref<8x128xbf16, #tpu.memory_space<vmem>>, %arg3: memref<128x32xbf16, #tpu.memory_space<vmem>>, %arg4: memref<1x32xf32, #tpu.memory_space<vmem>>, %arg5: memref<8x32xbf16, #tpu.memory_space<vmem>>, %arg6: memref<1x1x32xf32, #tpu.memory_space<vmem>>, %arg7: memref<1x1x32xf32, #tpu.memory_space<vmem>>) attributes {dimension_semantics = [#tpu.dimension_semantics<parallel>, #tpu.dimension_semantics<arbitrary>], iteration_bounds = array<i64: 2, 2>, scalar_prefetch = 0 : i64, scratch_operands = 0 : i64, tpu.core_type = #tpu.core_type<tc>, window_params = [{transform_indices = @transform_0, window_bounds = array<i64: 8, 128>}, {pipeline_mode = #tpu.pipeline_mode<synchronous>, transform_indices = @transform_1, window_bounds = array<i64: 128, 32>}, {pipeline_mode = #tpu.pipeline_mode<synchronous>, transform_indices = @transform_2, window_bounds = array<i64: 1, 32>}, {transform_indices = @transform_3, window_bounds = array<i64: 8, 32>}, {transform_indices = @transform_4, window_bounds = array<i64: 1, 1, 32>}, {transform_indices = @transform_5, window_bounds = array<i64: 1, 1, 32>}]} {
    %c0 = arith.constant 0 : index
    %c0_0 = arith.constant 0 : index
    %0 = vector.load %arg2[%c0, %c0_0] : memref<8x128xbf16, #tpu.memory_space<vmem>>, vector<8x128xbf16>
    %c0_1 = arith.constant 0 : index
    %c0_2 = arith.constant 0 : index
    %1 = vector.load %arg3[%c0_1, %c0_2] : memref<128x32xbf16, #tpu.memory_space<vmem>>, vector<128x32xbf16>
    %cst = arith.constant dense<0.000000e+00> : vector<8x32xf32>
    %2 = tpu.matmul %0, %1, %cst {dimension_numbers = #tpu.dot_dimension_numbers<[1], [0], [0], [1], [0, 0, 1, 1], [], []>} : vector<8x128xbf16>, vector<128x32xbf16>, vector<8x32xf32> -> vector<8x32xf32>
    %c0_3 = arith.constant 0 : index
    %c0_4 = arith.constant 0 : index
    %3 = vector.load %arg4[%c0_3, %c0_4] : memref<1x32xf32, #tpu.memory_space<vmem>>, vector<1x32xf32>
    %4 = vector.broadcast %3 : vector<1x32xf32> to vector<8x32xf32>
    %5 = arith.addf %2, %4 : vector<8x32xf32>
    %6 = arith.truncf %5 : vector<8x32xf32> to vector<8x32xbf16>
    %c0_5 = arith.constant 0 : index
    %c0_6 = arith.constant 0 : index
    %7 = vector.load %arg5[%c0_5, %c0_6] : memref<8x32xbf16, #tpu.memory_space<vmem>>, vector<8x32xbf16>
    tpu.vector_store %arg5[%c0_5, %c0_6], %6 {strides = array<i32>} : memref<8x32xbf16, #tpu.memory_space<vmem>>, vector<8x32xbf16>,
    %8 = arith.extf %6 : vector<8x32xbf16> to vector<8x32xf32>
    %c0_i32 = arith.constant 0 : i32
    %9 = arith.cmpi eq, %arg1, %c0_i32 : i32
    %10 = arith.extui %9 : i1 to i32
    %c0_i32_7 = arith.constant 0 : i32
    %11 = arith.cmpi ne, %10, %c0_i32_7 : i32
    scf.if %11 {
      %cst_22 = arith.constant 0.000000e+00 : f32
      %29 = vector.broadcast %cst_22 : f32 to vector<1x32xf32>
      %c0_23 = arith.constant 0 : index
      %c0_24 = arith.constant 0 : index
      %c0_25 = arith.constant 0 : index
      %30 = vector.load %arg6[%c0_23, %c0_24, %c0_25] : memref<1x1x32xf32, #tpu.memory_space<vmem>>, vector<1x1x32xf32>
      %31 = vector.shape_cast %30 : vector<1x1x32xf32> to vector<1x32xf32>
      %32 = vector.shape_cast %29 : vector<1x32xf32> to vector<1x1x32xf32>
      tpu.vector_store %arg6[%c0_23, %c0_24, %c0_25], %32 {strides = array<i32>} : memref<1x1x32xf32, #tpu.memory_space<vmem>>, vector<1x1x32xf32>,
      %cst_26 = arith.constant 0.000000e+00 : f32
      %33 = vector.broadcast %cst_26 : f32 to vector<1x32xf32>
      %c0_27 = arith.constant 0 : index
      %c0_28 = arith.constant 0 : index
      %c0_29 = arith.constant 0 : index
      %34 = vector.load %arg7[%c0_27, %c0_28, %c0_29] : memref<1x1x32xf32, #tpu.memory_space<vmem>>, vector<1x1x32xf32>
      %35 = vector.shape_cast %34 : vector<1x1x32xf32> to vector<1x32xf32>
      %36 = vector.shape_cast %33 : vector<1x32xf32> to vector<1x1x32xf32>
      tpu.vector_store %arg7[%c0_27, %c0_28, %c0_29], %36 {strides = array<i32>} : memref<1x1x32xf32, #tpu.memory_space<vmem>>, vector<1x1x32xf32>,
    } else {
    }
    %c0_8 = arith.constant 0 : index
    %c0_9 = arith.constant 0 : index
    %c0_10 = arith.constant 0 : index
    %12 = vector.load %arg6[%c0_8, %c0_9, %c0_10] : memref<1x1x32xf32, #tpu.memory_space<vmem>>, vector<1x1x32xf32>
    %13 = vector.shape_cast %12 : vector<1x1x32xf32> to vector<1x32xf32>
    %cst_11 = arith.constant dense<0.000000e+00> : vector<32xf32>
    %14 = vector.multi_reduction <add>, %8, %cst_11 [0] : vector<8x32xf32> to vector<32xf32>
    %15 = vector.shape_cast %14 : vector<32xf32> to vector<1x32xf32>
    %16 = arith.addf %13, %15 : vector<1x32xf32>
    %c0_12 = arith.constant 0 : index
    %c0_13 = arith.constant 0 : index
    %c0_14 = arith.constant 0 : index
    %17 = vector.load %arg6[%c0_12, %c0_13, %c0_14] : memref<1x1x32xf32, #tpu.memory_space<vmem>>, vector<1x1x32xf32>
    %18 = vector.shape_cast %17 : vector<1x1x32xf32> to vector<1x32xf32>
    %19 = vector.shape_cast %16 : vector<1x32xf32> to vector<1x1x32xf32>
    tpu.vector_store %arg6[%c0_12, %c0_13, %c0_14], %19 {strides = array<i32>} : memref<1x1x32xf32, #tpu.memory_space<vmem>>, vector<1x1x32xf32>,
    %c0_15 = arith.constant 0 : index
    %c0_16 = arith.constant 0 : index
    %c0_17 = arith.constant 0 : index
    %20 = vector.load %arg7[%c0_15, %c0_16, %c0_17] : memref<1x1x32xf32, #tpu.memory_space<vmem>>, vector<1x1x32xf32>
    %21 = vector.shape_cast %20 : vector<1x1x32xf32> to vector<1x32xf32>
    %22 = arith.mulf %8, %8 : vector<8x32xf32>
    %cst_18 = arith.constant dense<0.000000e+00> : vector<32xf32>
    %23 = vector.multi_reduction <add>, %22, %cst_18 [0] : vector<8x32xf32> to vector<32xf32>
    %24 = vector.shape_cast %23 : vector<32xf32> to vector<1x32xf32>
    %25 = arith.addf %21, %24 : vector<1x32xf32>
    %c0_19 = arith.constant 0 : index
    %c0_20 = arith.constant 0 : index
    %c0_21 = arith.constant 0 : index
    %26 = vector.load %arg7[%c0_19, %c0_20, %c0_21] : memref<1x1x32xf32, #tpu.memory_space<vmem>>, vector<1x1x32xf32>
    %27 = vector.shape_cast %26 : vector<1x1x32xf32> to vector<1x32xf32>
    %28 = vector.shape_cast %25 : vector<1x32xf32> to vector<1x1x32xf32>
    tpu.vector_store %arg7[%c0_19, %c0_20, %c0_21], %28 {strides = array<i32>} : memref<1x1x32xf32, #tpu.memory_space<vmem>>, vector<1x1x32xf32>,
    return
  }
  func.func @transform_0(%arg0: i32, %arg1: i32) -> (i32, i32) {
    %c2_i32 = arith.constant 2 : i32
    %0 = arith.muli %arg0, %c2_i32 : i32
    %1 = arith.addi %0, %arg1 : i32
    %c0_i32 = arith.constant 0 : i32
    %c0_i32_0 = arith.constant 0 : i32
    return %1, %c0_i32 : i32, i32
  }
  func.func @transform_1(%arg0: i32, %arg1: i32) -> (i32, i32) {
    %c0_i32 = arith.constant 0 : i32
    %c0_i32_0 = arith.constant 0 : i32
    %c0_i32_1 = arith.constant 0 : i32
    return %c0_i32, %c0_i32_0 : i32, i32
  }
  func.func @transform_2(%arg0: i32, %arg1: i32) -> (i32, i32) {
    %c0_i32 = arith.constant 0 : i32
    %c0_i32_0 = arith.constant 0 : i32
    %c0_i32_1 = arith.constant 0 : i32
    return %c0_i32, %c0_i32_0 : i32, i32
  }
  func.func @transform_3(%arg0: i32, %arg1: i32) -> (i32, i32) {
    %c2_i32 = arith.constant 2 : i32
    %0 = arith.muli %arg0, %c2_i32 : i32
    %1 = arith.addi %0, %arg1 : i32
    %c0_i32 = arith.constant 0 : i32
    %c0_i32_0 = arith.constant 0 : i32
    return %1, %c0_i32 : i32, i32
  }
  func.func @transform_4(%arg0: i32, %arg1: i32) -> (i32, i32, i32) {
    %c0_i32 = arith.constant 0 : i32
    %c0_i32_0 = arith.constant 0 : i32
    %c0_i32_1 = arith.constant 0 : i32
    return %arg0, %c0_i32, %c0_i32_0 : i32, i32, i32
  }
  func.func @transform_5(%arg0: i32, %arg1: i32) -> (i32, i32, i32) {
    %c0_i32 = arith.constant 0 : i32
    %c0_i32_0 = arith.constant 0 : i32
    %c0_i32_1 = arith.constant 0 : i32
    return %arg0, %c0_i32, %c0_i32_0 : i32, i32, i32
  }
}

module attributes {stable_mosaic.version = 11 : i64} {
  func.func @block_main_kernel(%arg0: i32, %arg1: i32, %arg2: memref<8x32xbf16, #tpu.memory_space<vmem>>, %arg3: memref<2x1x32xf32, #tpu.memory_space<vmem>>, %arg4: memref<2x1x32xf32, #tpu.memory_space<vmem>>, %arg5: memref<1x32xf32, #tpu.memory_space<vmem>>, %arg6: memref<1x32xf32, #tpu.memory_space<vmem>>, %arg7: memref<32x32xbf16, #tpu.memory_space<vmem>>, %arg8: memref<1x32xf32, #tpu.memory_space<vmem>>, %arg9: memref<2x1x32xf32, #tpu.memory_space<vmem>>, %arg10: memref<2x1x32xf32, #tpu.memory_space<vmem>>, %arg11: memref<1x32xf32, #tpu.memory_space<vmem>>, %arg12: memref<1x32xf32, #tpu.memory_space<vmem>>, %arg13: memref<32x32xbf16, #tpu.memory_space<vmem>>, %arg14: memref<128x32xbf16, #tpu.memory_space<vmem>>, %arg15: memref<1x32xf32, #tpu.memory_space<vmem>>, %arg16: memref<8x128xbf16, #tpu.memory_space<vmem>>, %arg17: memref<8x32xbf16, #tpu.memory_space<vmem>>, %arg18: memref<1x1x32xf32, #tpu.memory_space<vmem>>, %arg19: memref<1x1x32xf32, #tpu.memory_space<vmem>>) attributes {dimension_semantics = [#tpu.dimension_semantics<parallel>, #tpu.dimension_semantics<arbitrary>], iteration_bounds = array<i64: 2, 2>, scalar_prefetch = 0 : i64, scratch_operands = 0 : i64, tpu.core_type = #tpu.core_type<tc>, window_params = [{transform_indices = @transform_0, window_bounds = array<i64: 8, 32>}, {pipeline_mode = #tpu.pipeline_mode<synchronous>, transform_indices = @transform_1, window_bounds = array<i64: 2, 1, 32>}, {pipeline_mode = #tpu.pipeline_mode<synchronous>, transform_indices = @transform_2, window_bounds = array<i64: 2, 1, 32>}, {pipeline_mode = #tpu.pipeline_mode<synchronous>, transform_indices = @transform_3, window_bounds = array<i64: 1, 32>}, {pipeline_mode = #tpu.pipeline_mode<synchronous>, transform_indices = @transform_4, window_bounds = array<i64: 1, 32>}, {pipeline_mode = #tpu.pipeline_mode<synchronous>, transform_indices = @transform_5, window_bounds = array<i64: 32, 32>}, {pipeline_mode = #tpu.pipeline_mode<synchronous>, transform_indices = @transform_6, window_bounds = array<i64: 1, 32>}, {pipeline_mode = #tpu.pipeline_mode<synchronous>, transform_indices = @transform_7, window_bounds = array<i64: 2, 1, 32>}, {pipeline_mode = #tpu.pipeline_mode<synchronous>, transform_indices = @transform_8, window_bounds = array<i64: 2, 1, 32>}, {pipeline_mode = #tpu.pipeline_mode<synchronous>, transform_indices = @transform_9, window_bounds = array<i64: 1, 32>}, {pipeline_mode = #tpu.pipeline_mode<synchronous>, transform_indices = @transform_10, window_bounds = array<i64: 1, 32>}, {pipeline_mode = #tpu.pipeline_mode<synchronous>, transform_indices = @transform_11, window_bounds = array<i64: 32, 32>}, {pipeline_mode = #tpu.pipeline_mode<synchronous>, transform_indices = @transform_12, window_bounds = array<i64: 128, 32>}, {pipeline_mode = #tpu.pipeline_mode<synchronous>, transform_indices = @transform_13, window_bounds = array<i64: 1, 32>}, {transform_indices = @transform_14, window_bounds = array<i64: 8, 128>}, {transform_indices = @transform_15, window_bounds = array<i64: 8, 32>}, {transform_indices = @transform_16, window_bounds = array<i64: 1, 1, 32>}, {transform_indices = @transform_17, window_bounds = array<i64: 1, 1, 32>}]} {
    %c0 = arith.constant 0 : index
    %c0_0 = arith.constant 0 : index
    %0 = vector.load %arg2[%c0, %c0_0] : memref<8x32xbf16, #tpu.memory_space<vmem>>, vector<8x32xbf16>
    %1 = arith.extf %0 : vector<8x32xbf16> to vector<8x32xf32>
    %c0_1 = arith.constant 0 : index
    %c0_2 = arith.constant 0 : index
    %c0_3 = arith.constant 0 : index
    %2 = vector.load %arg3[%c0_1, %c0_2, %c0_3] : memref<2x1x32xf32, #tpu.memory_space<vmem>>, vector<2x1x32xf32>
    %c0_4 = arith.constant 0 : index
    %c0_5 = arith.constant 0 : index
    %c0_6 = arith.constant 0 : index
    %3 = vector.load %arg4[%c0_4, %c0_5, %c0_6] : memref<2x1x32xf32, #tpu.memory_space<vmem>>, vector<2x1x32xf32>
    %c0_7 = arith.constant 0 : index
    %c0_8 = arith.constant 0 : index
    %4 = vector.load %arg5[%c0_7, %c0_8] : memref<1x32xf32, #tpu.memory_space<vmem>>, vector<1x32xf32>
    %c0_9 = arith.constant 0 : index
    %c0_10 = arith.constant 0 : index
    %5 = vector.load %arg6[%c0_9, %c0_10] : memref<1x32xf32, #tpu.memory_space<vmem>>, vector<1x32xf32>
    %cst = arith.constant dense<0.000000e+00> : vector<1x32xf32>
    %6 = vector.multi_reduction <add>, %2, %cst [0] : vector<2x1x32xf32> to vector<1x32xf32>
    %cst_11 = arith.constant dense<0.000000e+00> : vector<1x32xf32>
    %7 = vector.multi_reduction <add>, %3, %cst_11 [0] : vector<2x1x32xf32> to vector<1x32xf32>
    %cst_12 = arith.constant 3.125000e-02 : f32
    %8 = vector.broadcast %cst_12 : f32 to vector<1x32xf32>
    %9 = arith.mulf %6, %8 : vector<1x32xf32>
    %cst_13 = arith.constant 3.125000e-02 : f32
    %10 = vector.broadcast %cst_13 : f32 to vector<1x32xf32>
    %11 = arith.mulf %7, %10 : vector<1x32xf32>
    %12 = arith.mulf %9, %9 : vector<1x32xf32>
    %13 = arith.subf %11, %12 : vector<1x32xf32>
    %cst_14 = arith.constant 0.000000e+00 : f32
    %14 = vector.broadcast %cst_14 : f32 to vector<1x32xf32>
    %15 = arith.maximumf %13, %14 : vector<1x32xf32>
    %16 = vector.broadcast %9 : vector<1x32xf32> to vector<8x32xf32>
    %17 = arith.subf %1, %16 : vector<8x32xf32>
    %cst_15 = arith.constant 9.99999974E-6 : f32
    %18 = vector.broadcast %cst_15 : f32 to vector<1x32xf32>
    %19 = arith.addf %15, %18 : vector<1x32xf32>
    %20 = math.rsqrt %19 : vector<1x32xf32>
    %21 = vector.broadcast %20 : vector<1x32xf32> to vector<8x32xf32>
    %22 = arith.mulf %17, %21 : vector<8x32xf32>
    %23 = vector.broadcast %4 : vector<1x32xf32> to vector<8x32xf32>
    %24 = arith.mulf %23, %22 : vector<8x32xf32>
    %25 = vector.broadcast %5 : vector<1x32xf32> to vector<8x32xf32>
    %26 = arith.addf %24, %25 : vector<8x32xf32>
    %cst_16 = arith.constant 0.000000e+00 : f32
    %27 = vector.broadcast %cst_16 : f32 to vector<8x32xf32>
    %28 = arith.maximumf %26, %27 : vector<8x32xf32>
    %29 = arith.truncf %28 : vector<8x32xf32> to vector<8x32xbf16>
    %c0_17 = arith.constant 0 : index
    %c0_18 = arith.constant 0 : index
    %30 = vector.load %arg7[%c0_17, %c0_18] : memref<32x32xbf16, #tpu.memory_space<vmem>>, vector<32x32xbf16>
    %cst_19 = arith.constant dense<0.000000e+00> : vector<8x32xf32>
    %31 = tpu.matmul %29, %30, %cst_19 {dimension_numbers = #tpu.dot_dimension_numbers<[1], [0], [0], [1], [0, 0, 1, 1], [], []>} : vector<8x32xbf16>, vector<32x32xbf16>, vector<8x32xf32> -> vector<8x32xf32>
    %c0_20 = arith.constant 0 : index
    %c0_21 = arith.constant 0 : index
    %32 = vector.load %arg8[%c0_20, %c0_21] : memref<1x32xf32, #tpu.memory_space<vmem>>, vector<1x32xf32>
    %33 = vector.broadcast %32 : vector<1x32xf32> to vector<8x32xf32>
    %34 = arith.addf %31, %33 : vector<8x32xf32>
    %c0_22 = arith.constant 0 : index
    %c0_23 = arith.constant 0 : index
    %c0_24 = arith.constant 0 : index
    %35 = vector.load %arg9[%c0_22, %c0_23, %c0_24] : memref<2x1x32xf32, #tpu.memory_space<vmem>>, vector<2x1x32xf32>
    %c0_25 = arith.constant 0 : index
    %c0_26 = arith.constant 0 : index
    %c0_27 = arith.constant 0 : index
    %36 = vector.load %arg10[%c0_25, %c0_26, %c0_27] : memref<2x1x32xf32, #tpu.memory_space<vmem>>, vector<2x1x32xf32>
    %c0_28 = arith.constant 0 : index
    %c0_29 = arith.constant 0 : index
    %37 = vector.load %arg11[%c0_28, %c0_29] : memref<1x32xf32, #tpu.memory_space<vmem>>, vector<1x32xf32>
    %c0_30 = arith.constant 0 : index
    %c0_31 = arith.constant 0 : index
    %38 = vector.load %arg12[%c0_30, %c0_31] : memref<1x32xf32, #tpu.memory_space<vmem>>, vector<1x32xf32>
    %cst_32 = arith.constant dense<0.000000e+00> : vector<1x32xf32>
    %39 = vector.multi_reduction <add>, %35, %cst_32 [0] : vector<2x1x32xf32> to vector<1x32xf32>
    %cst_33 = arith.constant dense<0.000000e+00> : vector<1x32xf32>
    %40 = vector.multi_reduction <add>, %36, %cst_33 [0] : vector<2x1x32xf32> to vector<1x32xf32>
    %cst_34 = arith.constant 3.125000e-02 : f32
    %41 = vector.broadcast %cst_34 : f32 to vector<1x32xf32>
    %42 = arith.mulf %39, %41 : vector<1x32xf32>
    %cst_35 = arith.constant 3.125000e-02 : f32
    %43 = vector.broadcast %cst_35 : f32 to vector<1x32xf32>
    %44 = arith.mulf %40, %43 : vector<1x32xf32>
    %45 = arith.mulf %42, %42 : vector<1x32xf32>
    %46 = arith.subf %44, %45 : vector<1x32xf32>
    %cst_36 = arith.constant 0.000000e+00 : f32
    %47 = vector.broadcast %cst_36 : f32 to vector<1x32xf32>
    %48 = arith.maximumf %46, %47 : vector<1x32xf32>
    %49 = vector.broadcast %42 : vector<1x32xf32> to vector<8x32xf32>
    %50 = arith.subf %34, %49 : vector<8x32xf32>
    %cst_37 = arith.constant 9.99999974E-6 : f32
    %51 = vector.broadcast %cst_37 : f32 to vector<1x32xf32>
    %52 = arith.addf %48, %51 : vector<1x32xf32>
    %53 = math.rsqrt %52 : vector<1x32xf32>
    %54 = vector.broadcast %53 : vector<1x32xf32> to vector<8x32xf32>
    %55 = arith.mulf %50, %54 : vector<8x32xf32>
    %56 = vector.broadcast %37 : vector<1x32xf32> to vector<8x32xf32>
    %57 = arith.mulf %56, %55 : vector<8x32xf32>
    %58 = vector.broadcast %38 : vector<1x32xf32> to vector<8x32xf32>
    %59 = arith.addf %57, %58 : vector<8x32xf32>
    %cst_38 = arith.constant 0.000000e+00 : f32
    %60 = vector.broadcast %cst_38 : f32 to vector<8x32xf32>
    %61 = arith.maximumf %59, %60 : vector<8x32xf32>
    %62 = arith.truncf %61 : vector<8x32xf32> to vector<8x32xbf16>
    %c0_39 = arith.constant 0 : index
    %c0_40 = arith.constant 0 : index
    %63 = vector.load %arg13[%c0_39, %c0_40] : memref<32x32xbf16, #tpu.memory_space<vmem>>, vector<32x32xbf16>
    %cst_41 = arith.constant dense<0.000000e+00> : vector<8x32xf32>
    %64 = tpu.matmul %62, %63, %cst_41 {dimension_numbers = #tpu.dot_dimension_numbers<[1], [0], [0], [1], [0, 0, 1, 1], [], []>} : vector<8x32xbf16>, vector<32x32xbf16>, vector<8x32xf32> -> vector<8x32xf32>
    %c0_42 = arith.constant 0 : index
    %c0_43 = arith.constant 0 : index
    %65 = vector.load %arg16[%c0_42, %c0_43] : memref<8x128xbf16, #tpu.memory_space<vmem>>, vector<8x128xbf16>
    %c0_44 = arith.constant 0 : index
    %c0_45 = arith.constant 0 : index
    %66 = vector.load %arg14[%c0_44, %c0_45] : memref<128x32xbf16, #tpu.memory_space<vmem>>, vector<128x32xbf16>
    %cst_46 = arith.constant dense<0.000000e+00> : vector<8x32xf32>
    %67 = tpu.matmul %65, %66, %cst_46 {dimension_numbers = #tpu.dot_dimension_numbers<[1], [0], [0], [1], [0, 0, 1, 1], [], []>} : vector<8x128xbf16>, vector<128x32xbf16>, vector<8x32xf32> -> vector<8x32xf32>
    %68 = arith.addf %64, %67 : vector<8x32xf32>
    %c0_47 = arith.constant 0 : index
    %c0_48 = arith.constant 0 : index
    %69 = vector.load %arg15[%c0_47, %c0_48] : memref<1x32xf32, #tpu.memory_space<vmem>>, vector<1x32xf32>
    %70 = vector.broadcast %69 : vector<1x32xf32> to vector<8x32xf32>
    %71 = arith.addf %68, %70 : vector<8x32xf32>
    %72 = arith.addf %71, %1 : vector<8x32xf32>
    %73 = arith.truncf %72 : vector<8x32xf32> to vector<8x32xbf16>
    %c0_49 = arith.constant 0 : index
    %c0_50 = arith.constant 0 : index
    %74 = vector.load %arg17[%c0_49, %c0_50] : memref<8x32xbf16, #tpu.memory_space<vmem>>, vector<8x32xbf16>
    tpu.vector_store %arg17[%c0_49, %c0_50], %73 {strides = array<i32>} : memref<8x32xbf16, #tpu.memory_space<vmem>>, vector<8x32xbf16>,
    %75 = arith.extf %73 : vector<8x32xbf16> to vector<8x32xf32>
    %c0_i32 = arith.constant 0 : i32
    %76 = arith.cmpi eq, %arg1, %c0_i32 : i32
    %77 = arith.extui %76 : i1 to i32
    %c0_i32_51 = arith.constant 0 : i32
    %78 = arith.cmpi ne, %77, %c0_i32_51 : i32
    scf.if %78 {
      %cst_66 = arith.constant 0.000000e+00 : f32
      %96 = vector.broadcast %cst_66 : f32 to vector<1x32xf32>
      %c0_67 = arith.constant 0 : index
      %c0_68 = arith.constant 0 : index
      %c0_69 = arith.constant 0 : index
      %97 = vector.load %arg18[%c0_67, %c0_68, %c0_69] : memref<1x1x32xf32, #tpu.memory_space<vmem>>, vector<1x1x32xf32>
      %98 = vector.shape_cast %97 : vector<1x1x32xf32> to vector<1x32xf32>
      %99 = vector.shape_cast %96 : vector<1x32xf32> to vector<1x1x32xf32>
      tpu.vector_store %arg18[%c0_67, %c0_68, %c0_69], %99 {strides = array<i32>} : memref<1x1x32xf32, #tpu.memory_space<vmem>>, vector<1x1x32xf32>,
      %cst_70 = arith.constant 0.000000e+00 : f32
      %100 = vector.broadcast %cst_70 : f32 to vector<1x32xf32>
      %c0_71 = arith.constant 0 : index
      %c0_72 = arith.constant 0 : index
      %c0_73 = arith.constant 0 : index
      %101 = vector.load %arg19[%c0_71, %c0_72, %c0_73] : memref<1x1x32xf32, #tpu.memory_space<vmem>>, vector<1x1x32xf32>
      %102 = vector.shape_cast %101 : vector<1x1x32xf32> to vector<1x32xf32>
      %103 = vector.shape_cast %100 : vector<1x32xf32> to vector<1x1x32xf32>
      tpu.vector_store %arg19[%c0_71, %c0_72, %c0_73], %103 {strides = array<i32>} : memref<1x1x32xf32, #tpu.memory_space<vmem>>, vector<1x1x32xf32>,
    } else {
    }
    %c0_52 = arith.constant 0 : index
    %c0_53 = arith.constant 0 : index
    %c0_54 = arith.constant 0 : index
    %79 = vector.load %arg18[%c0_52, %c0_53, %c0_54] : memref<1x1x32xf32, #tpu.memory_space<vmem>>, vector<1x1x32xf32>
    %80 = vector.shape_cast %79 : vector<1x1x32xf32> to vector<1x32xf32>
    %cst_55 = arith.constant dense<0.000000e+00> : vector<32xf32>
    %81 = vector.multi_reduction <add>, %75, %cst_55 [0] : vector<8x32xf32> to vector<32xf32>
    %82 = vector.shape_cast %81 : vector<32xf32> to vector<1x32xf32>
    %83 = arith.addf %80, %82 : vector<1x32xf32>
    %c0_56 = arith.constant 0 : index
    %c0_57 = arith.constant 0 : index
    %c0_58 = arith.constant 0 : index
    %84 = vector.load %arg18[%c0_56, %c0_57, %c0_58] : memref<1x1x32xf32, #tpu.memory_space<vmem>>, vector<1x1x32xf32>
    %85 = vector.shape_cast %84 : vector<1x1x32xf32> to vector<1x32xf32>
    %86 = vector.shape_cast %83 : vector<1x32xf32> to vector<1x1x32xf32>
    tpu.vector_store %arg18[%c0_56, %c0_57, %c0_58], %86 {strides = array<i32>} : memref<1x1x32xf32, #tpu.memory_space<vmem>>, vector<1x1x32xf32>,
    %c0_59 = arith.constant 0 : index
    %c0_60 = arith.constant 0 : index
    %c0_61 = arith.constant 0 : index
    %87 = vector.load %arg19[%c0_59, %c0_60, %c0_61] : memref<1x1x32xf32, #tpu.memory_space<vmem>>, vector<1x1x32xf32>
    %88 = vector.shape_cast %87 : vector<1x1x32xf32> to vector<1x32xf32>
    %89 = arith.mulf %75, %75 : vector<8x32xf32>
    %cst_62 = arith.constant dense<0.000000e+00> : vector<32xf32>
    %90 = vector.multi_reduction <add>, %89, %cst_62 [0] : vector<8x32xf32> to vector<32xf32>
    %91 = vector.shape_cast %90 : vector<32xf32> to vector<1x32xf32>
    %92 = arith.addf %88, %91 : vector<1x32xf32>
    %c0_63 = arith.constant 0 : index
    %c0_64 = arith.constant 0 : index
    %c0_65 = arith.constant 0 : index
    %93 = vector.load %arg19[%c0_63, %c0_64, %c0_65] : memref<1x1x32xf32, #tpu.memory_space<vmem>>, vector<1x1x32xf32>
    %94 = vector.shape_cast %93 : vector<1x1x32xf32> to vector<1x32xf32>
    %95 = vector.shape_cast %92 : vector<1x32xf32> to vector<1x1x32xf32>
    tpu.vector_store %arg19[%c0_63, %c0_64, %c0_65], %95 {strides = array<i32>} : memref<1x1x32xf32, #tpu.memory_space<vmem>>, vector<1x1x32xf32>,
    return
  }
  func.func @transform_0(%arg0: i32, %arg1: i32) -> (i32, i32) {
    %c2_i32 = arith.constant 2 : i32
    %0 = arith.muli %arg0, %c2_i32 : i32
    %1 = arith.addi %0, %arg1 : i32
    %c0_i32 = arith.constant 0 : i32
    %c0_i32_0 = arith.constant 0 : i32
    return %1, %c0_i32 : i32, i32
  }
  func.func @transform_1(%arg0: i32, %arg1: i32) -> (i32, i32, i32) {
    %c0_i32 = arith.constant 0 : i32
    %c0_i32_0 = arith.constant 0 : i32
    %c0_i32_1 = arith.constant 0 : i32
    %c0_i32_2 = arith.constant 0 : i32
    return %c0_i32, %c0_i32_0, %c0_i32_1 : i32, i32, i32
  }
  func.func @transform_2(%arg0: i32, %arg1: i32) -> (i32, i32, i32) {
    %c0_i32 = arith.constant 0 : i32
    %c0_i32_0 = arith.constant 0 : i32
    %c0_i32_1 = arith.constant 0 : i32
    %c0_i32_2 = arith.constant 0 : i32
    return %c0_i32, %c0_i32_0, %c0_i32_1 : i32, i32, i32
  }
  func.func @transform_3(%arg0: i32, %arg1: i32) -> (i32, i32) {
    %c0_i32 = arith.constant 0 : i32
    %c0_i32_0 = arith.constant 0 : i32
    %c0_i32_1 = arith.constant 0 : i32
    return %c0_i32, %c0_i32_0 : i32, i32
  }
  func.func @transform_4(%arg0: i32, %arg1: i32) -> (i32, i32) {
    %c0_i32 = arith.constant 0 : i32
    %c0_i32_0 = arith.constant 0 : i32
    %c0_i32_1 = arith.constant 0 : i32
    return %c0_i32, %c0_i32_0 : i32, i32
  }
  func.func @transform_5(%arg0: i32, %arg1: i32) -> (i32, i32) {
    %c0_i32 = arith.constant 0 : i32
    %c0_i32_0 = arith.constant 0 : i32
    %c0_i32_1 = arith.constant 0 : i32
    return %c0_i32, %c0_i32_0 : i32, i32
  }
  func.func @transform_6(%arg0: i32, %arg1: i32) -> (i32, i32) {
    %c0_i32 = arith.constant 0 : i32
    %c0_i32_0 = arith.constant 0 : i32
    %c0_i32_1 = arith.constant 0 : i32
    return %c0_i32, %c0_i32_0 : i32, i32
  }
  func.func @transform_7(%arg0: i32, %arg1: i32) -> (i32, i32, i32) {
    %c0_i32 = arith.constant 0 : i32
    %c0_i32_0 = arith.constant 0 : i32
    %c0_i32_1 = arith.constant 0 : i32
    %c0_i32_2 = arith.constant 0 : i32
    return %c0_i32, %c0_i32_0, %c0_i32_1 : i32, i32, i32
  }
  func.func @transform_8(%arg0: i32, %arg1: i32) -> (i32, i32, i32) {
    %c0_i32 = arith.constant 0 : i32
    %c0_i32_0 = arith.constant 0 : i32
    %c0_i32_1 = arith.constant 0 : i32
    %c0_i32_2 = arith.constant 0 : i32
    return %c0_i32, %c0_i32_0, %c0_i32_1 : i32, i32, i32
  }
  func.func @transform_9(%arg0: i32, %arg1: i32) -> (i32, i32) {
    %c0_i32 = arith.constant 0 : i32
    %c0_i32_0 = arith.constant 0 : i32
    %c0_i32_1 = arith.constant 0 : i32
    return %c0_i32, %c0_i32_0 : i32, i32
  }
  func.func @transform_10(%arg0: i32, %arg1: i32) -> (i32, i32) {
    %c0_i32 = arith.constant 0 : i32
    %c0_i32_0 = arith.constant 0 : i32
    %c0_i32_1 = arith.constant 0 : i32
    return %c0_i32, %c0_i32_0 : i32, i32
  }
  func.func @transform_11(%arg0: i32, %arg1: i32) -> (i32, i32) {
    %c0_i32 = arith.constant 0 : i32
    %c0_i32_0 = arith.constant 0 : i32
    %c0_i32_1 = arith.constant 0 : i32
    return %c0_i32, %c0_i32_0 : i32, i32
  }
  func.func @transform_12(%arg0: i32, %arg1: i32) -> (i32, i32) {
    %c0_i32 = arith.constant 0 : i32
    %c0_i32_0 = arith.constant 0 : i32
    %c0_i32_1 = arith.constant 0 : i32
    return %c0_i32, %c0_i32_0 : i32, i32
  }
  func.func @transform_13(%arg0: i32, %arg1: i32) -> (i32, i32) {
    %c0_i32 = arith.constant 0 : i32
    %c0_i32_0 = arith.constant 0 : i32
    %c0_i32_1 = arith.constant 0 : i32
    return %c0_i32, %c0_i32_0 : i32, i32
  }
  func.func @transform_14(%arg0: i32, %arg1: i32) -> (i32, i32) {
    %c2_i32 = arith.constant 2 : i32
    %0 = arith.muli %arg0, %c2_i32 : i32
    %1 = arith.addi %0, %arg1 : i32
    %c0_i32 = arith.constant 0 : i32
    %c0_i32_0 = arith.constant 0 : i32
    return %1, %c0_i32 : i32, i32
  }
  func.func @transform_15(%arg0: i32, %arg1: i32) -> (i32, i32) {
    %c2_i32 = arith.constant 2 : i32
    %0 = arith.muli %arg0, %c2_i32 : i32
    %1 = arith.addi %0, %arg1 : i32
    %c0_i32 = arith.constant 0 : i32
    %c0_i32_0 = arith.constant 0 : i32
    return %1, %c0_i32 : i32, i32
  }
  func.func @transform_16(%arg0: i32, %arg1: i32) -> (i32, i32, i32) {
    %c0_i32 = arith.constant 0 : i32
    %c0_i32_0 = arith.constant 0 : i32
    %c0_i32_1 = arith.constant 0 : i32
    return %arg0, %c0_i32, %c0_i32_0 : i32, i32, i32
  }
  func.func @transform_17(%arg0: i32, %arg1: i32) -> (i32, i32, i32) {
    %c0_i32 = arith.constant 0 : i32
    %c0_i32_0 = arith.constant 0 : i32
    %c0_i32_1 = arith.constant 0 : i32
    return %arg0, %c0_i32, %c0_i32_0 : i32, i32, i32
  }
}

module attributes {stable_mosaic.version = 11 : i64} {
  func.func @tail_kernel(%arg0: i32, %arg1: memref<8x32xbf16, #tpu.memory_space<vmem>>, %arg2: memref<2x1x32xf32, #tpu.memory_space<vmem>>, %arg3: memref<2x1x32xf32, #tpu.memory_space<vmem>>, %arg4: memref<1x32xf32, #tpu.memory_space<vmem>>, %arg5: memref<1x32xf32, #tpu.memory_space<vmem>>, %arg6: memref<32x128xbf16, #tpu.memory_space<vmem>>, %arg7: memref<1x128xf32, #tpu.memory_space<vmem>>, %arg8: memref<8x3xf32, #tpu.memory_space<vmem>>) attributes {dimension_semantics = [#tpu.dimension_semantics<parallel>], iteration_bounds = array<i64: 4>, scalar_prefetch = 0 : i64, scratch_operands = 0 : i64, tpu.core_type = #tpu.core_type<tc>, window_params = [{transform_indices = @transform_0, window_bounds = array<i64: 8, 32>}, {pipeline_mode = #tpu.pipeline_mode<synchronous>, transform_indices = @transform_1, window_bounds = array<i64: 2, 1, 32>}, {pipeline_mode = #tpu.pipeline_mode<synchronous>, transform_indices = @transform_2, window_bounds = array<i64: 2, 1, 32>}, {pipeline_mode = #tpu.pipeline_mode<synchronous>, transform_indices = @transform_3, window_bounds = array<i64: 1, 32>}, {pipeline_mode = #tpu.pipeline_mode<synchronous>, transform_indices = @transform_4, window_bounds = array<i64: 1, 32>}, {pipeline_mode = #tpu.pipeline_mode<synchronous>, transform_indices = @transform_5, window_bounds = array<i64: 32, 128>}, {pipeline_mode = #tpu.pipeline_mode<synchronous>, transform_indices = @transform_6, window_bounds = array<i64: 1, 128>}, {transform_indices = @transform_7, window_bounds = array<i64: 8, 3>}]} {
    %c0 = arith.constant 0 : index
    %c0_0 = arith.constant 0 : index
    %0 = vector.load %arg1[%c0, %c0_0] : memref<8x32xbf16, #tpu.memory_space<vmem>>, vector<8x32xbf16>
    %1 = arith.extf %0 : vector<8x32xbf16> to vector<8x32xf32>
    %c0_1 = arith.constant 0 : index
    %c0_2 = arith.constant 0 : index
    %c0_3 = arith.constant 0 : index
    %2 = vector.load %arg2[%c0_1, %c0_2, %c0_3] : memref<2x1x32xf32, #tpu.memory_space<vmem>>, vector<2x1x32xf32>
    %c0_4 = arith.constant 0 : index
    %c0_5 = arith.constant 0 : index
    %c0_6 = arith.constant 0 : index
    %3 = vector.load %arg3[%c0_4, %c0_5, %c0_6] : memref<2x1x32xf32, #tpu.memory_space<vmem>>, vector<2x1x32xf32>
    %c0_7 = arith.constant 0 : index
    %c0_8 = arith.constant 0 : index
    %4 = vector.load %arg4[%c0_7, %c0_8] : memref<1x32xf32, #tpu.memory_space<vmem>>, vector<1x32xf32>
    %c0_9 = arith.constant 0 : index
    %c0_10 = arith.constant 0 : index
    %5 = vector.load %arg5[%c0_9, %c0_10] : memref<1x32xf32, #tpu.memory_space<vmem>>, vector<1x32xf32>
    %cst = arith.constant dense<0.000000e+00> : vector<1x32xf32>
    %6 = vector.multi_reduction <add>, %2, %cst [0] : vector<2x1x32xf32> to vector<1x32xf32>
    %cst_11 = arith.constant dense<0.000000e+00> : vector<1x32xf32>
    %7 = vector.multi_reduction <add>, %3, %cst_11 [0] : vector<2x1x32xf32> to vector<1x32xf32>
    %cst_12 = arith.constant 3.125000e-02 : f32
    %8 = vector.broadcast %cst_12 : f32 to vector<1x32xf32>
    %9 = arith.mulf %6, %8 : vector<1x32xf32>
    %cst_13 = arith.constant 3.125000e-02 : f32
    %10 = vector.broadcast %cst_13 : f32 to vector<1x32xf32>
    %11 = arith.mulf %7, %10 : vector<1x32xf32>
    %12 = arith.mulf %9, %9 : vector<1x32xf32>
    %13 = arith.subf %11, %12 : vector<1x32xf32>
    %cst_14 = arith.constant 0.000000e+00 : f32
    %14 = vector.broadcast %cst_14 : f32 to vector<1x32xf32>
    %15 = arith.maximumf %13, %14 : vector<1x32xf32>
    %16 = vector.broadcast %9 : vector<1x32xf32> to vector<8x32xf32>
    %17 = arith.subf %1, %16 : vector<8x32xf32>
    %cst_15 = arith.constant 9.99999974E-6 : f32
    %18 = vector.broadcast %cst_15 : f32 to vector<1x32xf32>
    %19 = arith.addf %15, %18 : vector<1x32xf32>
    %20 = math.rsqrt %19 : vector<1x32xf32>
    %21 = vector.broadcast %20 : vector<1x32xf32> to vector<8x32xf32>
    %22 = arith.mulf %17, %21 : vector<8x32xf32>
    %23 = vector.broadcast %4 : vector<1x32xf32> to vector<8x32xf32>
    %24 = arith.mulf %23, %22 : vector<8x32xf32>
    %25 = vector.broadcast %5 : vector<1x32xf32> to vector<8x32xf32>
    %26 = arith.addf %24, %25 : vector<8x32xf32>
    %cst_16 = arith.constant 0.000000e+00 : f32
    %27 = vector.broadcast %cst_16 : f32 to vector<8x32xf32>
    %28 = arith.maximumf %26, %27 : vector<8x32xf32>
    %29 = arith.truncf %28 : vector<8x32xf32> to vector<8x32xbf16>
    %c0_17 = arith.constant 0 : index
    %c0_18 = arith.constant 0 : index
    %30 = vector.load %arg6[%c0_17, %c0_18] : memref<32x128xbf16, #tpu.memory_space<vmem>>, vector<32x128xbf16>
    %cst_19 = arith.constant dense<0.000000e+00> : vector<8x128xf32>
    %31 = tpu.matmul %29, %30, %cst_19 {dimension_numbers = #tpu.dot_dimension_numbers<[1], [0], [0], [1], [0, 0, 1, 1], [], []>} : vector<8x32xbf16>, vector<32x128xbf16>, vector<8x128xf32> -> vector<8x128xf32>
    %c0_20 = arith.constant 0 : index
    %c0_21 = arith.constant 0 : index
    %32 = vector.load %arg7[%c0_20, %c0_21] : memref<1x128xf32, #tpu.memory_space<vmem>>, vector<1x128xf32>
    %33 = vector.broadcast %32 : vector<1x128xf32> to vector<8x128xf32>
    %34 = arith.addf %31, %33 : vector<8x128xf32>
    %35 = vector.extract_strided_slice %34 {offsets = [0, 0], sizes = [8, 3], strides = [1, 1]} : vector<8x128xf32> to vector<8x3xf32>
    %c0_22 = arith.constant 0 : index
    %c0_23 = arith.constant 0 : index
    %36 = vector.load %arg8[%c0_22, %c0_23] : memref<8x3xf32, #tpu.memory_space<vmem>>, vector<8x3xf32>
    tpu.vector_store %arg8[%c0_22, %c0_23], %35 {strides = array<i32>} : memref<8x3xf32, #tpu.memory_space<vmem>>, vector<8x3xf32>,
    return
  }
  func.func @transform_0(%arg0: i32) -> (i32, i32) {
    %c0_i32 = arith.constant 0 : i32
    %c0_i32_0 = arith.constant 0 : i32
    return %arg0, %c0_i32 : i32, i32
  }
  func.func @transform_1(%arg0: i32) -> (i32, i32, i32) {
    %c0_i32 = arith.constant 0 : i32
    %c0_i32_0 = arith.constant 0 : i32
    %c0_i32_1 = arith.constant 0 : i32
    %c0_i32_2 = arith.constant 0 : i32
    return %c0_i32, %c0_i32_0, %c0_i32_1 : i32, i32, i32
  }
  func.func @transform_2(%arg0: i32) -> (i32, i32, i32) {
    %c0_i32 = arith.constant 0 : i32
    %c0_i32_0 = arith.constant 0 : i32
    %c0_i32_1 = arith.constant 0 : i32
    %c0_i32_2 = arith.constant 0 : i32
    return %c0_i32, %c0_i32_0, %c0_i32_1 : i32, i32, i32
  }
  func.func @transform_3(%arg0: i32) -> (i32, i32) {
    %c0_i32 = arith.constant 0 : i32
    %c0_i32_0 = arith.constant 0 : i32
    %c0_i32_1 = arith.constant 0 : i32
    return %c0_i32, %c0_i32_0 : i32, i32
  }
  func.func @transform_4(%arg0: i32) -> (i32, i32) {
    %c0_i32 = arith.constant 0 : i32
    %c0_i32_0 = arith.constant 0 : i32
    %c0_i32_1 = arith.constant 0 : i32
    return %c0_i32, %c0_i32_0 : i32, i32
  }
  func.func @transform_5(%arg0: i32) -> (i32, i32) {
    %c0_i32 = arith.constant 0 : i32
    %c0_i32_0 = arith.constant 0 : i32
    %c0_i32_1 = arith.constant 0 : i32
    return %c0_i32, %c0_i32_0 : i32, i32
  }
  func.func @transform_6(%arg0: i32) -> (i32, i32) {
    %c0_i32 = arith.constant 0 : i32
    %c0_i32_0 = arith.constant 0 : i32
    %c0_i32_1 = arith.constant 0 : i32
    return %c0_i32, %c0_i32_0 : i32, i32
  }
  func.func @transform_7(%arg0: i32) -> (i32, i32) {
    %c0_i32 = arith.constant 0 : i32
    %c0_i32_0 = arith.constant 0 : i32
    return %arg0, %c0_i32 : i32, i32
  }
}

</mosaic_0001>

<bundles_post_ra>
// kernel: scorenet_forward.6
= control target key start
LH: loop header
LB: loop body
LE: loop exit
PB: predicated region body
PF: predicated region fallthrough
CT: control target
= control target key end

     0   :  { %s719_s18 = smov 0   ;;  %s721_s19 = smov 0   ;;  %s822_s0 = inlined_call_operand.vmem [shape: bf16[32,128], index: 0, kind: input, shape index: {}]   ;;  %s823_s1 = inlined_call_operand.vmem [shape: bf16[128,32], index: 1, kind: input, shape index: {}]   ;;  %s824_s2 = inlined_call_operand.vmem [shape: f32[1,32], index: 2, kind: input, shape index: {}]   ;;  %s825_s3 = inlined_call_operand.vmem [shape: bf16[32,32], index: 3, kind: output, shape index: {0}]   ;;  %s826_s4 = inlined_call_operand.vmem [shape: f32[2,1,32], index: 4, kind: output, shape index: {1}]   ;;  %s827_s5 = inlined_call_operand.vmem [shape: f32[2,1,32], index: 5, kind: output, shape index: {2}]  }
   0x1   :  { %s723_s20 = smov 0   ;;  %s725_s21 = smov 0  }
   0x2   :  { %s727_s22 = smov 0  }
   0x3 LB: > { %s25_s23 = sadd.s32 1, %s676_s20  ;;  %s28_s24 = sadd.s32 1, %s680_s21  ;;  %s684_s22 = sphi %s727_s22, %s16_s22   ;;  %s680_s21 = sphi %s725_s21, %s831_s21   ;;  %s676_s20 = sphi %s723_s20, %s830_s20   ;;  %s672_s19 = sphi %s721_s19, %s829_s19   ;;  %s668_s18 = sphi %s719_s18, %s828_s18  }
   0x4   : > { %p26_p0 = scmp.ge.s32.totalorder %s25_s23, 2  ;;  %p549_p1 = scmp.ge.s32.totalorder %s684_s22, 1 }
   0x5   : > { %p215_p2 = scmp.lt.s32.totalorder %s684_s22, 5 }
   0x6   : > { %s833_s23 = smov (%p26_p0, %s25_s23), 0  ;;  %s835_s24 = smov (!%p26_p0, %s28_s24), %s680_s21 }
   0x7   : > { %p216_p3 = pnand %p549_p1, %p215_p2  ;;  %p30_p4 = scmp.ge.s32.totalorder %s835_s24, 2 }
   0x8   : > { %p267_p5 = scmp.lt.s32.totalorder (!%p216_p3), %s672_s19, 1  ;;  %v686_v0 = vmov (!%p216_p3), 0.0   ;;  %v638_v1 = vld [vmem:[%s823_s1] sm:$0xff] (!%p216_p3)   ;;  %vm687_vm0 = vmmov (!%p216_p3), 0   ;;  %v639_v2 = vld [vmem:[%s823_s1 + $0x8] sm:$0xff] (!%p216_p3)   ;;  %v640_v3 = vld [vmem:[%s823_s1 + $0x10] sm:$0xff] (!%p216_p3)  }
   0x9   : > { %s837_s24 = smov (%p30_p4, %s835_s24), 0  ;;  %219 = sbr.rel (%p216_p3) target bundleno = 278 (0x116), region = 32 }
   0xa   : > { %575 = vmatprep.subr.bf16.mxu0 (!%p216_p3), %v686_v0  ;;  %591 = vmatprep.mubr.msk.bf16.mxu0 (!%p216_p3), %vm687_vm0, %v686_v0  ;;  %v641_v4 = vld [vmem:[%s823_s1 + $0x18] sm:$0xff] (!%p216_p3)   ;;  %s550_s15 = sshll.u32 (!%p216_p3), %s672_s19, 1  ;;  %v642_v5 = vld [vmem:[%s823_s1 + $0x20] sm:$0xff] (!%p216_p3)   ;;  %v643_v6 = vld [vmem:[%s823_s1 + $0x28] sm:$0xff] (!%p216_p3)   ;;  %vm387_vm1 = vcmask (!%p216_p3), 257024   ;;  %p563_p7 = scmp.ne.s32.totalorder (!%p216_p3), %s668_s18, 0 }
   0xb   : > { %576 = vmatpush3.bf16.msra.mxu0 (!%p216_p3), %v638_v1  ;;  %s252_s16 = sadd.s32 (!%p216_p3), %s668_s18, %s550_s15  ;;  %v644_v7 = vld [vmem:[%s823_s1 + $0x30] sm:$0xff] (!%p216_p3)   ;;  %v645_v8 = vld [vmem:[%s823_s1 + $0x38] sm:$0xff] (!%p216_p3)   ;;  %v554_v10 = vld [vmem:[%s824_s2] ss:$0 sm:$0xff] (!%p216_p3) }
   0xc   : > { %577 = vmatprep.subr.bf16.mxu0 (!%p216_p3), %v686_v0  ;;  %p253_p6 = scmp.lt.s32.totalorder (!%p216_p3), %s252_s16, 3 }
   0xf   : > { %578 = vmatpush3.bf16.msra.mxu0 (!%p216_p3), %v639_v2 }
  0x10   : > { %s268_s27 = scalar_select %p267_p5, %s672_s19, 1  ;;  %579 = vmatprep.subr.bf16.mxu0 %v686_v0 }
  0x11   : > { %s839_s16 = smov (!%p253_p6, %s252_s16), 3  ;;  %vm394_vm2 = vcmask (!%p563_p7), 253952   ;;  %v688_v18 = vmov (!%p563_p7), 0.0  }
  0x12   : > { %s764_s7 = scalar_lea.vmem %s826_s4, %s268_s27  ;;  %s769_s10 = scalar_lea.vmem %s827_s5, %s268_s27 }
  0x13   : > { %580 = vmatpush3.bf16.msra.mxu0 %v640_v3  ;;  %s551_s19 = sshll.u32 %s839_s16, 2  ;;  %395 = vst.msk [vmem:[%s764_s7] sm:$0x1] (!%p563_p7), %vm394_vm2, %v688_v18  ;;  %396 = vst.msk [vmem:[%s769_s10] sm:$0x1] (!%p563_p7), %vm394_vm2, %v688_v18 }
  0x14   : > { %581 = vmatprep.subr.bf16.mxu0 %v686_v0  ;;  %s256_s11 = scalar_lea.vmem %s822_s0, %s551_s19  ;;  %s264_s16 = scalar_lea.vmem %s825_s3, %s551_s19 }
  0x15   : > { %v274_v9 = vld [vmem:[%s256_s11] sm:$0xf] }
  0x17   : > { %582 = vmatpush3.bf16.msra.mxu0 %v641_v4 }
  0x18   : > { %583 = vmatprep.subr.bf16.mxu0 %v686_v0 }
  0x1b   : > { %584 = vmatpush3.bf16.msra.mxu0 %v642_v5 }
  0x1c   : > { %585 = vmatprep.subr.bf16.mxu0 %v686_v0 }
  0x1f   : > { %586 = vmatpush3.bf16.msra.mxu0 %v643_v6 }
  0x20   : > { %587 = vmatprep.subr.bf16.mxu0 %v686_v0 }
  0x23   : > { %588 = vmatpush3.bf16.msra.mxu0 %v644_v7 }
  0x24   : > { %589 = vmatprep.subr.bf16.mxu0 %v686_v0 }
  0x27   : > { %590 = vmatpush3.bf16.msra.mxu0 %v645_v8 }
  0x2a   : > { %592 = vmatmul.mubr.bf16.vlgmr.msra.gmra.mrb[0].mxu0 %v274_v9 }
  0xfc   : > { %393 = sbr.rel (%p563_p7) target bundleno = 259 (0x103), region = 36 }
  0xfd   : > { %v380_v11 = vpop.f32.mrb[0].mxu0 }
  0xfe   : > { %v381_v12 = vadd.f32 %v554_v10, %v380_v11  ;;  %v593_v13 = vpop.f32.mrb[1].mxu0 }
  0xff   : > { %v383_v14 = vpop.f32.mrb[2].mxu0 }
 0x100   : > { %v386_v15 = vpack.c.bf16 %v381_v12, %v381_v12  ;;  %v594_v16 = vpop.f32.mrb[3].mxu0 }
 0x102   : > { %388 = vst.msk [vmem:[%s264_s16] sm:$0xf] %vm387_vm1, %v386_v15  ;;  %v389_v17 = vunpack.c.l.bf16 %v386_v15 }
 0x103 PF: > { %vm398_vm3 = vcmask 261120   ;;  %v397_v31 = vld [vmem:[%s764_s7] sm:$0x1]  ;;  %vm407_vm4 = vcmask 253952  }
 0x104   : > { %v410_v19 = vmul.f32 %v389_v17, %v389_v17  ;;  %v399_v20 = vsel %vm398_vm3, %v389_v17, 0.0  ;;  %v409_v34 = vld [vmem:[%s769_s10] sm:$0x1] }
 0x105   : > { %v400_v21 = vrot.slane %v399_v20, 4 }
 0x106   : > { %v411_v22 = vsel %vm398_vm3, %v410_v19, 0.0 }
 0x107   : > { %v412_v23 = vrot.slane %v411_v22, 4  ;;  %v401_v24 = vadd.f32 %v400_v21, %v399_v20 }
 0x109   : > { %v413_v25 = vadd.f32 %v412_v23, %v411_v22  ;;  %v402_v26 = vrot.slane %v401_v24, 2 }
 0x10b   : > { %v414_v27 = vrot.slane %v413_v25, 2  ;;  %v403_v28 = vadd.f32 %v402_v26, %v401_v24 }
 0x10d   : > { %v415_v29 = vadd.f32 %v414_v27, %v413_v25  ;;  %v404_v30 = vrot.slane %v403_v28, 1 }
 0x10f   : > { %v416_v32 = vrot.slane %v415_v29, 1  ;;  %v405_v33 = vadd.f32 %v404_v30, %v403_v28 }
 0x111   : > { %v417_v35 = vadd.f32 %v416_v32, %v415_v29  ;;  %v406_v36 = vadd.f32 %v405_v33, %v397_v31 }
 0x113   : > { %v418_v37 = vadd.f32 %v417_v35, %v409_v34  ;;  %408 = vst.msk [vmem:[%s764_s7] sm:$0x1] %vm407_vm4, %v406_v36 }
 0x115   : > { %419 = vst.msk [vmem:[%s769_s10] sm:$0x1] %vm407_vm4, %v418_v37 }
 0x116 PF: > { %s16_s22 = sadd.s32 1, %s684_s22   ;;  %s828_s18 = smov %s676_s20 }
 0x117   : > { %p13_p8 = scmp.ge.s32.totalorder %s16_s22, 6   ;;  %s829_s19 = smov %s680_s21 }
 0x118   : > { %s830_s20 = smov %s833_s23  ;;  %s831_s21 = smov %s837_s24 }
 0x119   :  { %15 = sbr.rel (!%p13_p8) target bundleno = 3 (0x3), region = 90 }

// kernel: scorenet_forward.7
= control target key start
LH: loop header
LB: loop body
LE: loop exit
PB: predicated region body
PF: predicated region fallthrough
CT: control target
= control target key end

     0   :  { %s724_s27 = smov 0   ;;  %s726_s28 = smov 0   ;;  %s835_s0 = inlined_call_operand.vmem [shape: bf16[32,32], index: 0, kind: input, shape index: {}]   ;;  %s836_s1 = inlined_call_operand.vmem [shape: f32[2,1,32], index: 1, kind: input, shape index: {}]   ;;  %s837_s2 = inlined_call_operand.vmem [shape: f32[2,1,32], index: 2, kind: input, shape index: {}]   ;;  %s838_s3 = inlined_call_operand.vmem [shape: f32[1,32], index: 3, kind: input, shape index: {}]   ;;  %s839_s4 = inlined_call_operand.vmem [shape: f32[1,32], index: 4, kind: input, shape index: {}]   ;;  %s840_s5 = inlined_call_operand.vmem [shape: bf16[32,32], index: 5, kind: input, shape index: {}]   ;;  %s841_s6 = inlined_call_operand.vmem [shape: f32[1,32], index: 6, kind: input, shape index: {}]   ;;  %s842_s7 = inlined_call_operand.vmem [shape: f32[2,1,32], index: 7, kind: output, shape index: {0}]   ;;  %s843_s8 = inlined_call_operand.vmem [shape: f32[2,1,32], index: 8, kind: output, shape index: {1}]  }
   0x1   :  { %s728_s29 = smov 0   ;;  %s730_s30 = smov 0  }
   0x2   :  { %s732_s9 = smov 0  }
   0x3 LB: > { %s28_s10 = sadd.s32 1, %s666_s29  ;;  %s31_s11 = sadd.s32 1, %s670_s30  ;;  %s674_s9 = sphi %s732_s9, %s19_s9   ;;  %s670_s30 = sphi %s730_s30, %s847_s30   ;;  %s666_s29 = sphi %s728_s29, %s846_s29   ;;  %s662_s28 = sphi %s726_s28, %s845_s28   ;;  %s658_s27 = sphi %s724_s27, %s844_s27  }
   0x4   : > { %p29_p0 = scmp.ge.s32.totalorder %s28_s10, 2  ;;  %p566_p1 = scmp.ge.s32.totalorder %s674_s9, 1 }
   0x5   : > { %p284_p2 = scmp.lt.s32.totalorder %s674_s9, 5 }
   0x6   : > { %s849_s10 = smov (%p29_p0, %s28_s10), 0  ;;  %s851_s11 = smov (!%p29_p0, %s31_s11), %s670_s30 }
   0x7   : > { %p285_p3 = pnand %p566_p1, %p284_p2  ;;  %p33_p4 = scmp.ge.s32.totalorder %s851_s11, 2 }
   0x8   : > { %p328_p5 = scmp.lt.s32.totalorder (!%p285_p3), %s662_s28, 1  ;;  %v676_v0 = vmov (!%p285_p3), 0.0   ;;  %v632_v1 = vld [vmem:[%s840_s5] sm:$0xff] (!%p285_p3)   ;;  %v633_v2 = vld [vmem:[%s840_s5 + $0x8] sm:$0xff] (!%p285_p3)   ;;  %vm677_vm0 = vmmov (!%p285_p3), 0   ;;  %s567_s21 = sshll.u32 (!%p285_p3), %s662_s28, 1  ;;  %v355_v16 = vlaneseq (!%p285_p3) }
   0x9   : > { %s853_s11 = smov (%p33_p4, %s851_s11), 0  ;;  %288 = sbr.rel (%p285_p3) target bundleno = 280 (0x118), region = 48 }
   0xa   : > { %581 = vmatprep.subr.bf16.mxu0 (!%p285_p3), %v676_v0  ;;  %585 = vmatprep.mubr.msk.bf16.mxu0 (!%p285_p3), %vm677_vm0, %v676_v0  ;;  %v337_v3 = vld [vmem:[%s836_s1] sm:$0x1] (!%p285_p3)  ;;  %v338_v4 = vld [vmem:[%s836_s1 + $0x1] sm:$0x1] (!%p285_p3)  ;;  %vm343_vm1 = vcmask (!%p285_p3), 253952   ;;  %v356_v19 = vshrl.u32 (!%p285_p3), %v355_v16, 7 }
   0xb   : > { %582 = vmatpush3.bf16.msra.mxu0 (!%p285_p3), %v632_v1  ;;  %v339_v5 = vld [vmem:[%s837_s2] sm:$0x1] (!%p285_p3)  ;;  %v340_v6 = vld [vmem:[%s837_s2 + $0x1] sm:$0x1] (!%p285_p3)  ;;  %v344_v7 = vsel (!%p285_p3), %vm343_vm1, %v337_v3, 0.0  ;;  %v345_v8 = vsel (!%p285_p3), %vm343_vm1, %v338_v4, 0.0 }
   0xc   : > { %583 = vmatprep.subr.bf16.mxu0 (!%p285_p3), %v676_v0  ;;  %v346_v9 = vadd.f32 (!%p285_p3), %v345_v8, %v344_v7  ;;  %v347_v10 = vsel (!%p285_p3), %vm343_vm1, %v339_v5, 0.0  ;;  %v348_v11 = vsel (!%p285_p3), %vm343_vm1, %v340_v6, 0.0  ;;  %v357_v21 = vsub.s32 (!%p285_p3), 0, %v356_v19  ;;  %v569_v28 = vld [vmem:[%s838_s3] ss:$0 sm:$0xff] (!%p285_p3)  ;;  %p575_p7 = scmp.ne.s32.totalorder (!%p285_p3), %s658_s27, 0 }
   0xd   : > { %v349_v12 = vadd.f32 (!%p285_p3), %v348_v11, %v347_v10  ;;  %v570_v30 = vld [vmem:[%s839_s4] ss:$0 sm:$0xff] (!%p285_p3)  ;;  %vm406_vm2 = vcmask (!%p285_p3), 261120  }
   0xe   : > { %v350_v13 = vmul.f32 (!%p285_p3), 0.03125, %v346_v9  ;;  %v571_v35 = vld [vmem:[%s841_s6] ss:$0 sm:$0xff] (!%p285_p3) }
   0xf   : > { %584 = vmatpush3.bf16.msra.mxu0 (!%p285_p3), %v633_v2  ;;  %v351_v14 = vmul.f32 (!%p285_p3), 0.03125, %v349_v12 }
  0x10   : > { %s329_s14 = scalar_select %p328_p5, %s662_s28, 1  ;;  %v352_v15 = vmul.f32 %v350_v13, %v350_v13  ;;  %v358_v24 = vrot.slane %v350_v13, %v357_v21 }
  0x11   : > { %s321_s28 = sadd.s32 %s658_s27, %s567_s21  ;;  %v678_v41 = vmov (!%p575_p7), 0.0  }
  0x12   : > { %s782_s13 = scalar_lea.vmem %s842_s7, %s329_s14  ;;  %s787_s17 = scalar_lea.vmem %s843_s8, %s329_s14  ;;  %v353_v17 = vsub.f32 %v351_v14, %v352_v15 }
  0x13   : > { %p322_p6 = scmp.lt.s32.totalorder %s321_s28, 3  ;;  %454 = vst.msk [vmem:[%s782_s13] sm:$0x1] (!%p575_p7), %vm343_vm1, %v678_v41  ;;  %455 = vst.msk [vmem:[%s787_s17] sm:$0x1] (!%p575_p7), %vm343_vm1, %v678_v41 }
  0x14   : > { %v354_v18 = vmax.f32 %v353_v17, 0.0 }
  0x15   : > { %s855_s28 = smov (!%p322_p6, %s321_s28), 3 }
  0x16   : > { %s568_s14 = sshll.u32 %s855_s28, 2  ;;  %v360_v20 = vadd.f32 1e-05, %v354_v18 }
  0x17   : > { %s325_s20 = scalar_lea.vmem %s835_s0, %s568_s14 }
  0x18   : > { %634 = vrsqrt.f32 %v360_v20  ;;  %v335_v22 = vld [vmem:[%s325_s20] sm:$0xf] }
  0x19   : > { %v336_v23 = vunpack.c.l.bf16 %v335_v22 }
  0x1b   : > { %v359_v25 = vsub.f32 %v336_v23, %v358_v24 }
  0x22   : > { %v635_v26 = vpop.eup %634 }
  0x23   : > { %v365_v27 = vrot.slane %v635_v26, %v357_v21 }
  0x25   : > { %v366_v29 = vmul.f32 %v365_v27, %v359_v25 }
  0x27   : > { %v373_v31 = vmul.f32 %v569_v28, %v366_v29 }
  0x29   : > { %v380_v32 = vadd.f32 %v570_v30, %v373_v31 }
  0x2b   : > { %v381_v33 = vmax.f32 %v380_v32, 0.0 }
  0x2d   : > { %v382_v34 = vpack.c.bf16 %v381_v33, %v381_v33 }
  0x2f   : > { %586 = vmatmul.mubr.msk.bf16.vlgmr.msra.gmra.mrb[0].mxu0 %vm406_vm2, %v382_v34 }
  0xff   : > { %453 = sbr.rel (%p575_p7) target bundleno = 262 (0x106), region = 52 }
 0x102   : > { %v444_v36 = vpop.f32.mrb[0].mxu0 }
 0x103   : > { %v445_v37 = vadd.f32 %v571_v35, %v444_v36  ;;  %v587_v38 = vpop.f32.mrb[1].mxu0 }
 0x104   : > { %v447_v39 = vpop.f32.mrb[2].mxu0 }
 0x105   : > { %v588_v40 = vpop.f32.mrb[3].mxu0 }
 0x106 PF: > { %v457_v42 = vsel %vm406_vm2, %v445_v37, 0.0  ;;  %v467_v43 = vmul.f32 %v445_v37, %v445_v37  ;;  %v456_v54 = vld [vmem:[%s782_s13] sm:$0x1] }
 0x107   : > { %v458_v44 = vrot.slane %v457_v42, 4  ;;  %v466_v57 = vld [vmem:[%s787_s17] sm:$0x1] }
 0x108   : > { %v468_v45 = vsel %vm406_vm2, %v467_v43, 0.0 }
 0x109   : > { %v459_v46 = vadd.f32 %v458_v44, %v457_v42  ;;  %v469_v47 = vrot.slane %v468_v45, 4 }
 0x10b   : > { %v460_v48 = vrot.slane %v459_v46, 2  ;;  %v470_v49 = vadd.f32 %v469_v47, %v468_v45 }
 0x10d   : > { %v461_v50 = vadd.f32 %v460_v48, %v459_v46  ;;  %v471_v51 = vrot.slane %v470_v49, 2 }
 0x10f   : > { %v462_v52 = vrot.slane %v461_v50, 1  ;;  %v472_v53 = vadd.f32 %v471_v51, %v470_v49 }
 0x111   : > { %v463_v55 = vadd.f32 %v462_v52, %v461_v50  ;;  %v473_v56 = vrot.slane %v472_v53, 1 }
 0x113   : > { %v464_v58 = vadd.f32 %v463_v55, %v456_v54  ;;  %v474_v59 = vadd.f32 %v473_v56, %v472_v53 }
 0x115   : > { %465 = vst.msk [vmem:[%s782_s13] sm:$0x1] %vm343_vm1, %v464_v58  ;;  %v475_v60 = vadd.f32 %v474_v59, %v466_v57 }
 0x117   : > { %476 = vst.msk [vmem:[%s787_s17] sm:$0x1] %vm343_vm1, %v475_v60 }
 0x118 PF: > { %s19_s9 = sadd.s32 1, %s674_s9   ;;  %s844_s27 = smov %s666_s29 }
 0x119   : > { %p16_p8 = scmp.ge.s32.totalorder %s19_s9, 6   ;;  %s845_s28 = smov %s670_s30 }
 0x11a   : > { %s846_s29 = smov %s849_s10  ;;  %s847_s30 = smov %s853_s11 }
 0x11b   :  { %18 = sbr.rel (!%p16_p8) target bundleno = 3 (0x3), region = 94 }

// kernel: scorenet_forward.8
= control target key start
LH: loop header
LB: loop body
LE: loop exit
PB: predicated region body
PF: predicated region fallthrough
CT: control target
= control target key end

     0   :  { %s1409_s24 = smov 0   ;;  %s1411_s25 = smov 0   ;;  %s1618_s0 = inlined_call_operand.vmem [shape: bf16[32,32], index: 0, kind: input, shape index: {}, may-alias: {0,15}]   ;;  %s1619_s1 = inlined_call_operand.vmem [shape: f32[2,1,32], index: 1, kind: input, shape index: {}]   ;;  %s1620_s2 = inlined_call_operand.vmem [shape: f32[2,1,32], index: 2, kind: input, shape index: {}]   ;;  %s1621_s3 = inlined_call_operand.vmem [shape: f32[1,32], index: 3, kind: input, shape index: {}]   ;;  %s1622_s4 = inlined_call_operand.vmem [shape: f32[1,32], index: 4, kind: input, shape index: {}]   ;;  %s1623_s5 = inlined_call_operand.vmem [shape: bf16[32,32], index: 5, kind: input, shape index: {}]   ;;  %s1624_s6 = inlined_call_operand.vmem [shape: f32[1,32], index: 6, kind: input, shape index: {}]   ;;  %s1625_s7 = inlined_call_operand.vmem [shape: f32[2,1,32], index: 7, kind: input, shape index: {}]   ;;  %s1626_s8 = inlined_call_operand.vmem [shape: f32[2,1,32], index: 8, kind: input, shape index: {}]   ;;  %s1627_s9 = inlined_call_operand.vmem [shape: f32[1,32], index: 9, kind: input, shape index: {}]   ;;  %s1628_s10 = inlined_call_operand.vmem [shape: f32[1,32], index: 10, kind: input, shape index: {}]   ;;  %s1629_s11 = inlined_call_operand.vmem [shape: bf16[32,32], index: 11, kind: input, shape index: {}]   ;;  %s1630_s12 = inlined_call_operand.vmem [shape: bf16[128,32], index: 12, kind: input, shape index: {}]   ;;  %s1631_s13 = inlined_call_operand.vmem [shape: f32[1,32], index: 13, kind: input, shape index: {}]   ;;  %s1632_s14 = inlined_call_operand.vmem [shape: bf16[32,128], index: 14, kind: input, shape index: {}]   ;;  %s1633_s15 = inlined_call_operand.vmem [shape: bf16[32,32], index: 15, kind: output, shape index: {0}, may-alias: {0,15}]   ;;  %s1634_s16 = inlined_call_operand.vmem [shape: f32[2,1,32], index: 16, kind: output, shape index: {1}]   ;;  %s1635_s17 = inlined_call_operand.vmem [shape: f32[2,1,32], index: 17, kind: output, shape index: {2}]  }
   0x1   :  { %1639 = sst [smem:[#allocation5_spill]] %s1618_s0  ;;  %s1413_s26 = smov 0  }
   0x2   :  { %1640 = sst [smem:[#allocation6_spill]] %s1619_s1  ;;  %s1415_s27 = smov 0  }
   0x3   :  { %1641 = sst [smem:[#allocation7_spill]] %s1623_s5  ;;  %s1417_s28 = smov 0  }
   0x4 LB: > { %1642 = sst [smem:[#allocation2_spill]] %s1310_s27  ;;  %s37_s29 = sadd.s32 1, %s1306_s26  ;;  %s1314_s28 = sphi %s1417_s28, %s28_s28   ;;  %s1310_s27 = sphi %s1415_s27, %s1650_s27   ;;  %s1306_s26 = sphi %s1413_s26, %s1652_s26   ;;  %s1302_s25 = sphi %s1411_s25, %s1648_s25   ;;  %s1298_s24 = sphi %s1409_s24, %s1651_s24  }
   0x5   : > { %s40_s0 = sadd.s32 1, %s1310_s27  ;;  %p38_p0 = scmp.ge.s32.totalorder %s37_s29, 2 }
   0x6   : > { %p1136_p1 = scmp.ge.s32.totalorder %s1314_s28, 1  ;;  %p532_p2 = scmp.lt.s32.totalorder %s1314_s28, 5 }
   0x7   : > { %s1654_s29 = smov (%p38_p0, %s37_s29), 0  ;;  %s1656_s0 = smov (!%p38_p0, %s40_s0), %s1310_s27 }
   0x8   : > { %1643 = sst [smem:[#allocation3_spill]] %s1654_s29  ;;  %p533_p3 = pnand %p1136_p1, %p532_p2 }
   0x9   : > { %p42_p4 = scmp.ge.s32.totalorder %s1656_s0, 2  ;;  %p622_p5 = scmp.lt.s32.totalorder (!%p533_p3), %s1302_s25, 1  ;;  %v1316_v0 = vmov (!%p533_p3), 0.0   ;;  %vm1317_vm0 = vmmov (!%p533_p3), 0   ;;  %v633_v5 = vld [vmem:[%s1620_s2] sm:$0x1] (!%p533_p3)  ;;  %v649_v17 = vlaneseq (!%p533_p3) }
   0xa   : > { %536 = sbr.rel (%p533_p3) target bundleno = 520 (0x208), region = 80  ;;  %1181 = vmatprep.subr.bf16.mxu0 (!%p533_p3), %v1316_v0  ;;  %s1645_s5 = sld [smem:[#allocation7_spill]] (!%p533_p3)  ;;  %1189 = vmatprep.subr.bf16.mxu1 (!%p533_p3), %v1316_v0  ;;  %v634_v6 = vld [vmem:[%s1620_s2 + $0x1] sm:$0x1] (!%p533_p3)  ;;  %vm637_vm1 = vcmask (!%p533_p3), 253952   ;;  %v1263_v15 = vld [vmem:[%s1630_s12 + $0x8] sm:$0xff] (!%p533_p3)  }
   0xb   : > { %s1658_s0 = smov (%p42_p4, %s1656_s0), 0  ;;  %1185 = vmatprep.mubr.msk.bf16.mxu0 (!%p533_p3), %vm1317_vm0, %v1316_v0  ;;  %s1646_s23 = sld [smem:[#allocation6_spill]] (!%p533_p3)  ;;  %1205 = vmatprep.mubr.msk.bf16.mxu1 (!%p533_p3), %vm1317_vm0, %v1316_v0  ;;  %v641_v10 = vsel (!%p533_p3), %vm637_vm1, %v633_v5, 0.0  ;;  %v642_v11 = vsel (!%p533_p3), %vm637_vm1, %v634_v6, 0.0  ;;  %v1262_v12 = vld [vmem:[%s1630_s12] sm:$0xff] (!%p533_p3)   ;;  %v1264_v20 = vld [vmem:[%s1630_s12 + $0x10] sm:$0xff] (!%p533_p3)  }
   0xc   : > { %1644 = sst [smem:[#allocation4_spill]] %s1658_s0  ;;  %s1137_s30 = sshll.u32 (!%p533_p3), %s1302_s25, 1  ;;  %v643_v13 = vadd.f32 (!%p533_p3), %v642_v11, %v641_v10  ;;  %1190 = vmatpush3.bf16.msra.mxu1 (!%p533_p3), %v1262_v12  ;;  %v650_v21 = vshrl.u32 (!%p533_p3), %v649_v17, 7  ;;  %v1265_v24 = vld [vmem:[%s1630_s12 + $0x18] sm:$0xff] (!%p533_p3)   ;;  %v1266_v27 = vld [vmem:[%s1630_s12 + $0x20] sm:$0xff] (!%p533_p3)   ;;  %vm700_vm2 = vcmask (!%p533_p3), 261120  }
   0xd   : > { %1191 = vmatprep.subr.bf16.mxu1 (!%p533_p3), %v1316_v0  ;;  %s1647_s18 = sld [smem:[#allocation5_spill]] (!%p533_p3)  ;;  %v1143_v33 = vld [vmem:[%s1621_s3] ss:$0 sm:$0xff] (!%p533_p3)  ;;  %v1267_v40 = vld [vmem:[%s1630_s12 + $0x28] sm:$0xff] (!%p533_p3)   ;;  %v1268_v41 = vld [vmem:[%s1630_s12 + $0x30] sm:$0xff] (!%p533_p3)   ;;  %vm963_vm3 = vcmask (!%p533_p3), 257024  }
   0xe   : > { %v645_v16 = vmul.f32 (!%p533_p3), 0.03125, %v643_v13  ;;  %v1508_v25 = vsub.s32 (!%p533_p3), 0, %v650_v21  ;;  %v1144_v35 = vld [vmem:[%s1622_s4] ss:$0 sm:$0xff] (!%p533_p3)  ;;  %v1270_v43 = vld [vmem:[%s1630_s12 + $0x38] sm:$0xff] (!%p533_p3)   ;;  %v1271_v44 = vld [vmem:[%s1629_s11 + $0x8] sm:$0xff] (!%p533_p3)  }
   0xf   : > { %v1269_v42 = vld [vmem:[%s1629_s11] sm:$0xff] (!%p533_p3)   ;;  %p1163_p7 = scmp.ne.s32.totalorder (!%p533_p3), %s1298_s24, 0 }
  0x10   : > { %v1260_v1 = vld [vmem:[%s1645_s5] sm:$0xff] (!%p533_p3)   ;;  %v1261_v2 = vld [vmem:[%s1645_s5 + $0x8] sm:$0xff] (!%p533_p3)   ;;  %1192 = vmatpush3.bf16.msra.mxu1 (!%p533_p3), %v1263_v15 }
  0x11   : > { %s623_s19 = scalar_select %p622_p5, %s1302_s25, 1  ;;  %v631_v3 = vld [vmem:[%s1646_s23] sm:$0x1]  ;;  %v632_v4 = vld [vmem:[%s1646_s23 + $0x1] sm:$0x1]  ;;  %1182 = vmatpush3.bf16.msra.mxu0 %v1260_v1  ;;  %1193 = vmatprep.subr.bf16.mxu1 %v1316_v0 }
  0x12   : > { %1183 = vmatprep.subr.bf16.mxu0 %v1316_v0  ;;  %v638_v7 = vsel %vm637_vm1, %v631_v3, 0.0  ;;  %v639_v8 = vsel %vm637_vm1, %v632_v4, 0.0  ;;  %s599_s25 = sadd.s32 %s1298_s24, %s1137_s30  ;;  %v744_v46 = vld [vmem:[%s1625_s7] sm:$0x1]  ;;  %v745_v47 = vld [vmem:[%s1625_s7 + $0x1] sm:$0x1] }
  0x13   : > { %s1473_s27 = scalar_lea.vmem %s1634_s16, %s623_s19  ;;  %s1478_s23 = scalar_lea.vmem %s1635_s17, %s623_s19  ;;  %v640_v9 = vadd.f32 %v639_v8, %v638_v7  ;;  %v750_v48 = vsel %vm637_vm1, %v744_v46, 0.0  ;;  %v751_v49 = vsel %vm637_vm1, %v745_v47, 0.0  ;;  %v746_v50 = vld [vmem:[%s1626_s8] sm:$0x1]  ;;  %v747_v51 = vld [vmem:[%s1626_s8 + $0x1] sm:$0x1] }
  0x14   : > { %p600_p6 = scmp.lt.s32.totalorder %s599_s25, 3  ;;  %1194 = vmatpush3.bf16.msra.mxu1 %v1264_v20  ;;  %v752_v52 = vadd.f32 %v751_v49, %v750_v48  ;;  %v753_v53 = vsel %vm637_vm1, %v746_v50, 0.0  ;;  %v754_v54 = vsel %vm637_vm1, %v747_v51, 0.0  ;;  %v1145_v63 = vld [vmem:[%s1624_s6] ss:$0 sm:$0xff] }
  0x15   : > { %1184 = vmatpush3.bf16.msra.mxu0 %v1261_v2  ;;  %v644_v14 = vmul.f32 0.03125, %v640_v9  ;;  %1195 = vmatprep.subr.bf16.mxu1 %v1316_v0  ;;  %v755_v55 = vadd.f32 %v754_v54, %v753_v53  ;;  %v1149_v8 = vld [vmem:[%s1627_s9] ss:$0 sm:$0xff] }
  0x16   : > { %1209 = vmatprep.subr.bf16.mxu0 %v1316_v0  ;;  %s1660_s25 = smov (!%p600_p6, %s599_s25), 3  ;;  %v756_v56 = vmul.f32 0.03125, %v752_v52  ;;  %v1150_v10 = vld [vmem:[%s1628_s10] ss:$0 sm:$0xff] }
  0x17   : > { %v646_v18 = vmul.f32 %v644_v14, %v644_v14  ;;  %s1498_s21 = sshll.u32 %s1660_s25, 2  ;;  %v652_v29 = vrot.slane %v644_v14, %v1508_v25  ;;  %v757_v57 = vmul.f32 0.03125, %v755_v55  ;;  %v1162_v20 = vld [vmem:[%s1631_s13] ss:$0 sm:$0xff] }
  0x18   : > { %s603_s19 = scalar_lea.vmem %s1647_s18, %s1498_s21  ;;  %1196 = vmatpush3.bf16.msra.mxu1 %v1265_v24  ;;  %s611_s18 = scalar_lea.vmem %s1632_s14, %s1498_s21  ;;  %v758_v58 = vmul.f32 %v756_v56, %v756_v56 }
  0x19   : > { %v647_v19 = vsub.f32 %v645_v16, %v646_v18  ;;  %v1510_v26 = vld [vmem:[%s603_s19] sm:$0xf]  ;;  %1197 = vmatprep.subr.bf16.mxu1 %v1316_v0  ;;  %s619_s5 = scalar_lea.vmem %s1633_s15, %s1498_s21 }
  0x1a   : > { %v630_v28 = vunpack.c.l.bf16 %v1510_v26  ;;  %v793_v45 = vld [vmem:[%s611_s18] sm:$0xf]  ;;  %v759_v59 = vsub.f32 %v757_v57, %v758_v58 }
  0x1b   : > { %v648_v22 = vmax.f32 %v647_v19, 0.0 }
  0x1c   : > { %1198 = vmatpush3.bf16.msra.mxu1 %v1266_v27  ;;  %v653_v30 = vsub.f32 %v630_v28, %v652_v29  ;;  %v760_v60 = vmax.f32 %v759_v59, 0.0 }
  0x1d   : > { %v654_v23 = vadd.f32 1e-05, %v648_v22  ;;  %1199 = vmatprep.subr.bf16.mxu1 %v1316_v0 }
  0x1e   : > { %v766_v61 = vadd.f32 1e-05, %v760_v60 }
  0x1f   : > { %1272 = vrsqrt.f32 %v654_v23 }
  0x20   : > { %1200 = vmatpush3.bf16.msra.mxu1 %v1267_v40  ;;  %1274 = vrsqrt.f32 %v766_v61 }
  0x21   : > { %1201 = vmatprep.subr.bf16.mxu1 %v1316_v0 }
  0x24   : > { %1202 = vmatpush3.bf16.msra.mxu1 %v1268_v41 }
  0x25   : > { %1203 = vmatprep.subr.bf16.mxu1 %v1316_v0 }
  0x28   : > { %1204 = vmatpush3.bf16.msra.mxu1 %v1270_v43 }
  0x29   : > { %v1273_v31 = vpop.eup %1272 }
  0x2a   : > { %v659_v32 = vrot.slane %v1273_v31, %v1508_v25  ;;  %v1275_v62 = vpop.eup %1274  ;;  %v1318_v31 = vmov (!%p1163_p7), 0.0  }
  0x2b   : > { %1206 = vmatmul.mubr.bf16.vlgmr.msra.gmra.mrb[0].mxu1 %v793_v45  ;;  %v771_v3 = vrot.slane %v1275_v62, %v1508_v25  ;;  %970 = vst.msk [vmem:[%s1473_s27] sm:$0x1] (!%p1163_p7), %vm637_vm1, %v1318_v31  ;;  %971 = vst.msk [vmem:[%s1478_s23] sm:$0x1] (!%p1163_p7), %vm637_vm1, %v1318_v31 }
  0x2c   : > { %v660_v34 = vmul.f32 %v659_v32, %v653_v30 }
  0x2e   : > { %v667_v36 = vmul.f32 %v1143_v33, %v660_v34 }
  0x30   : > { %v674_v37 = vadd.f32 %v1144_v35, %v667_v36 }
  0x32   : > { %v675_v38 = vmax.f32 %v674_v37, 0.0 }
  0x34   : > { %v676_v39 = vpack.c.bf16 %v675_v38, %v675_v38 }
  0x36   : > { %1186 = vmatmul.mubr.msk.bf16.vlgmr.msra.gmra.mrb[0].mxu0 %vm700_vm2, %v676_v39 }
  0x37   : > { %1213 = vmatprep.mubr.msk.bf16.mxu0 %vm1317_vm0, %v1316_v0  ;;  %1210 = vmatpush3.bf16.msra.mxu0 %v1269_v42 }
  0x38   : > { %1211 = vmatprep.subr.bf16.mxu0 %v1316_v0  ;;  %v764_v0 = vrot.slane %v756_v56, %v1508_v25 }
  0x3b   : > { %1212 = vmatpush3.bf16.msra.mxu0 %v1271_v44 }
  0xfe   : > { %v892_v15 = vpop.f32.mrb[0].mxu1 }
  0xff   : > { %v1207_v16 = vpop.f32.mrb[1].mxu1 }
 0x100   : > { %v895_v17 = vpop.f32.mrb[2].mxu1 }
 0x101   : > { %v1208_v18 = vpop.f32.mrb[3].mxu1 }
 0x109   : > { %v738_v1 = vpop.f32.mrb[0].mxu0 }
 0x10a   : > { %v739_v2 = vadd.f32 %v1145_v63, %v738_v1  ;;  %v1187_v4 = vpop.f32.mrb[1].mxu0 }
 0x10b   : > { %v741_v5 = vpop.f32.mrb[2].mxu0 }
 0x10c   : > { %v765_v6 = vsub.f32 %v739_v2, %v764_v0  ;;  %v1188_v7 = vpop.f32.mrb[3].mxu0 }
 0x10e   : > { %v772_v9 = vmul.f32 %v771_v3, %v765_v6 }
 0x110   : > { %v779_v11 = vmul.f32 %v1149_v8, %v772_v9 }
 0x112   : > { %v786_v12 = vadd.f32 %v1150_v10, %v779_v11 }
 0x114   : > { %v787_v13 = vmax.f32 %v786_v12, 0.0 }
 0x116   : > { %v788_v14 = vpack.c.bf16 %v787_v13, %v787_v13 }
 0x118   : > { %1214 = vmatmul.mubr.msk.bf16.vlgmr.msra.gmra.mrb[4].mxu0 %vm700_vm2, %v788_v14 }
 0x1eb   : > { %v947_v19 = vpop.f32.mrb[4].mxu0 }
 0x1ec   : > { %v948_v21 = vadd.f32 %v947_v19, %v892_v15  ;;  %v1215_v22 = vpop.f32.mrb[5].mxu0 }
 0x1ed   : > { %v950_v23 = vpop.f32.mrb[6].mxu0 }
 0x1ee   : > { %v960_v24 = vadd.f32 %v1162_v20, %v948_v21  ;;  %v1216_v25 = vpop.f32.mrb[7].mxu0  ;;  %969 = sbr.rel (%p1163_p7) target bundleno = 501 (0x1f5), region = 84 }
 0x1f0   : > { %v961_v27 = vadd.f32 %v960_v24, %v630_v28 }
 0x1f2   : > { %v962_v29 = vpack.c.bf16 %v961_v27, %v961_v27 }
 0x1f4   : > { %964 = vst.msk [vmem:[%s619_s5] sm:$0xf] %vm963_vm3, %v962_v29  ;;  %v965_v30 = vunpack.c.l.bf16 %v962_v29 }
 0x1f5 PF: > { %v972_v42 = vld [vmem:[%s1473_s27] sm:$0x1] }
 0x1f6   : > { %v973_v26 = vsel %vm700_vm2, %v965_v30, 0.0  ;;  %v983_v28 = vmul.f32 %v965_v30, %v965_v30  ;;  %v982_v45 = vld [vmem:[%s1478_s23] sm:$0x1] }
 0x1f7   : > { %v974_v32 = vrot.slane %v973_v26, 4 }
 0x1f8   : > { %v984_v33 = vsel %vm700_vm2, %v983_v28, 0.0 }
 0x1f9   : > { %v975_v34 = vadd.f32 %v974_v32, %v973_v26  ;;  %v985_v35 = vrot.slane %v984_v33, 4 }
 0x1fb   : > { %v976_v36 = vrot.slane %v975_v34, 2  ;;  %v986_v37 = vadd.f32 %v985_v35, %v984_v33 }
 0x1fd   : > { %v977_v38 = vadd.f32 %v976_v36, %v975_v34  ;;  %v987_v39 = vrot.slane %v986_v37, 2 }
 0x1ff   : > { %v978_v40 = vrot.slane %v977_v38, 1  ;;  %v988_v41 = vadd.f32 %v987_v39, %v986_v37 }
 0x201   : > { %v979_v43 = vadd.f32 %v978_v40, %v977_v38  ;;  %v989_v44 = vrot.slane %v988_v41, 1 }
 0x203   : > { %v980_v46 = vadd.f32 %v979_v43, %v972_v42  ;;  %v990_v47 = vadd.f32 %v989_v44, %v988_v41 }
 0x205   : > { %981 = vst.msk [vmem:[%s1473_s27] sm:$0x1] %vm637_vm1, %v980_v46  ;;  %v991_v48 = vadd.f32 %v990_v47, %v982_v45 }
 0x207   : > { %992 = vst.msk [vmem:[%s1478_s23] sm:$0x1] %vm637_vm1, %v991_v48 }
 0x208 PF: > { %s28_s28 = sadd.s32 1, %s1314_s28   ;;  %s1648_s25 = sld [smem:[#allocation2_spill]] }
 0x209   : > { %p25_p8 = scmp.ge.s32.totalorder %s28_s28, 6   ;;  %s1649_s21 = sld [smem:[#allocation3_spill]] }
 0x20a   : > { %s1650_s27 = sld [smem:[#allocation4_spill]]  ;;  %s1651_s24 = smov %s1306_s26 }
 0x20b   :  { %27 = sbr.rel (!%p25_p8) target bundleno = 4 (0x4), region = 141 }
 0x20f   : > { %s1652_s26 = smov %s1649_s21 }

// kernel: scorenet_forward.11
= control target key start
LH: loop header
LB: loop body
LE: loop exit
PB: predicated region body
PF: predicated region fallthrough
CT: control target
= control target key end

     0   :  { %s535_s24 = smov 0   ;;  %s583_s0 = inlined_call_operand.vmem [shape: bf16[32,32], index: 0, kind: input, shape index: {}]   ;;  %s584_s1 = inlined_call_operand.vmem [shape: f32[2,1,32], index: 1, kind: input, shape index: {}]   ;;  %s585_s2 = inlined_call_operand.vmem [shape: f32[2,1,32], index: 2, kind: input, shape index: {}]   ;;  %s586_s3 = inlined_call_operand.vmem [shape: f32[1,32], index: 3, kind: input, shape index: {}]   ;;  %s587_s4 = inlined_call_operand.vmem [shape: f32[1,32], index: 4, kind: input, shape index: {}]   ;;  %s588_s5 = inlined_call_operand.vmem [shape: bf16[32,128], index: 5, kind: input, shape index: {}]   ;;  %s589_s6 = inlined_call_operand.vmem [shape: f32[1,128], index: 6, kind: input, shape index: {}]   ;;  %s590_s7 = inlined_call_operand.vmem [shape: f32[32,3], index: 7, kind: output, shape index: {}]  }
   0x1 LB: > { %s445_s25 = sadd.s32 4294967295, %s491_s24   ;;  %p449_p0 = scmp.ge.s32.totalorder %s491_s24, 1  ;;  %s491_s24 = sphi %s535_s24, %s17_s24  }
   0x2   : > { %p236_p1 = scmp.lt.s32.totalorder %s491_s24, 5 }
   0x4   : > { %p237_p2 = pnand %p449_p0, %p236_p1 }
   0x5   : > { %v481_v0 = vld [vmem:[%s588_s5] sm:$0xff] (!%p237_p2)   ;;  %v493_v1 = vmov (!%p237_p2), 0.0   ;;  %v482_v2 = vld [vmem:[%s588_s5 + $0x8] sm:$0xff] (!%p237_p2)   ;;  %vm494_vm0 = vmmov (!%p237_p2), 0   ;;  %vm283_vm1 = vcmask (!%p237_p2), 253952   ;;  %p266_p3 = scmp.lt.s32.totalorder (!%p237_p2), %s445_s25, 3  ;;  %v295_v16 = vlaneseq (!%p237_p2) }
   0x6   : > { %240 = sbr.rel (%p237_p2) target bundleno = 258 (0x102), region = 48  ;;  %463 = vmatprep.subr.bf16.mxu0 (!%p237_p2), %v493_v1  ;;  %467 = vmatprep.mubr.msk.bf16.mxu0 (!%p237_p2), %vm494_vm0, %v493_v1  ;;  %v277_v3 = vld [vmem:[%s584_s1] sm:$0x1] (!%p237_p2)  ;;  %v278_v4 = vld [vmem:[%s584_s1 + $0x1] sm:$0x1] (!%p237_p2)  ;;  %vm346_vm2 = vcmask (!%p237_p2), 261120  }
   0x7   : > { %464 = vmatpush3.bf16.msra.mxu0 (!%p237_p2), %v481_v0  ;;  %v279_v5 = vld [vmem:[%s585_s2] sm:$0x1] (!%p237_p2)  ;;  %v280_v6 = vld [vmem:[%s585_s2 + $0x1] sm:$0x1] (!%p237_p2)  ;;  %v284_v7 = vsel (!%p237_p2), %vm283_vm1, %v277_v3, 0.0  ;;  %v285_v8 = vsel (!%p237_p2), %vm283_vm1, %v278_v4, 0.0 }
   0x8   : > { %465 = vmatprep.subr.bf16.mxu0 (!%p237_p2), %v493_v1  ;;  %v287_v9 = vsel (!%p237_p2), %vm283_vm1, %v279_v5, 0.0  ;;  %v286_v10 = vadd.f32 (!%p237_p2), %v285_v8, %v284_v7  ;;  %v288_v11 = vsel (!%p237_p2), %vm283_vm1, %v280_v6, 0.0  ;;  %v296_v19 = vshrl.u32 (!%p237_p2), %v295_v16, 7  ;;  %v452_v28 = vld [vmem:[%s586_s3] ss:$0 sm:$0xff] (!%p237_p2) }
   0x9   : > { %v289_v12 = vadd.f32 (!%p237_p2), %v288_v11, %v287_v9  ;;  %v453_v30 = vld [vmem:[%s587_s4] ss:$0 sm:$0xff] (!%p237_p2)  ;;  %vm390_vm3 = vcmask (!%p237_p2), 23552  }
   0xa   : > { %v290_v13 = vmul.f32 (!%p237_p2), 0.03125, %v286_v10  ;;  %v297_v21 = vsub.s32 (!%p237_p2), 0, %v296_v19  ;;  %v454_v35 = vld [vmem:[%s589_s6] ss:$0 sm:$0xff] (!%p237_p2) }
   0xb   : > { %466 = vmatpush3.bf16.msra.mxu0 (!%p237_p2), %v482_v2  ;;  %v291_v14 = vmul.f32 (!%p237_p2), 0.03125, %v289_v12 }
   0xc   : > { %v292_v15 = vmul.f32 (!%p237_p2), %v290_v13, %v290_v13  ;;  %v298_v24 = vrot.slane (!%p237_p2), %v290_v13, %v297_v21 }
   0xd   : > { %s592_s25 = smov (!%p266_p3, %s445_s25), 3 }
   0xe   : > { %v293_v17 = vsub.f32 %v291_v14, %v292_v15  ;;  %s450_s15 = sshll.u32 %s592_s25, 2  ;;  %s451_s23 = sshll.u32 %s592_s25, 3 }
   0xf   : > { %s269_s18 = scalar_lea.vmem %s583_s0, %s450_s15  ;;  %s273_s30 = scalar_lea.vmem %s590_s7, %s451_s23 }
  0x10   : > { %v294_v18 = vmax.f32 %v293_v17, 0.0  ;;  %v275_v22 = vld [vmem:[%s269_s18] sm:$0xf] }
  0x11   : > { %v276_v23 = vunpack.c.l.bf16 %v275_v22 }
  0x12   : > { %v300_v20 = vadd.f32 1e-05, %v294_v18 }
  0x13   : > { %v299_v25 = vsub.f32 %v276_v23, %v298_v24 }
  0x14   : > { %483 = vrsqrt.f32 %v300_v20 }
  0x1e   : > { %v484_v26 = vpop.eup %483 }
  0x1f   : > { %v305_v27 = vrot.slane %v484_v26, %v297_v21 }
  0x21   : > { %v306_v29 = vmul.f32 %v305_v27, %v299_v25 }
  0x23   : > { %v313_v31 = vmul.f32 %v452_v28, %v306_v29 }
  0x25   : > { %v320_v32 = vadd.f32 %v453_v30, %v313_v31 }
  0x27   : > { %v321_v33 = vmax.f32 %v320_v32, 0.0 }
  0x29   : > { %v322_v34 = vpack.c.bf16 %v321_v33, %v321_v33 }
  0x2b   : > { %468 = vmatmul.mubr.msk.bf16.vlgmr.msra.gmra.mrb[0].mxu0 %vm346_vm2, %v322_v34 }
  0xfe   : > { %v384_v36 = vpop.f32.mrb[0].mxu0 }
  0xff   : > { %v385_v37 = vadd.f32 %v454_v35, %v384_v36  ;;  %v469_v38 = vpop.f32.mrb[1].mxu0 }
 0x100   : > { %v387_v39 = vpop.f32.mrb[2].mxu0 }
 0x101   : > { %391 = vst.msk [vmem:[%s273_s30] sm:$0xff] %vm390_vm3, %v385_v37  ;;  %v470_v40 = vpop.f32.mrb[3].mxu0 }
 0x102 PF: > { %s17_s24 = sadd.s32 1, %s491_s24  }
 0x103   : > { %p14_p4 = scmp.ge.s32.totalorder %s17_s24, 6  }
 0x105   :  { %16 = sbr.rel (!%p14_p4) target bundleno = 1 (0x1), region = 78 }

</bundles_post_ra>
